<compile_context>
chip_gen: v6e
topology: v6e:2x2x1
jax: 0.10.0
libtpu: 0.0.40
codegen_flags: <defaults>
</compile_context>

<pallas_src>
import jax
import jax.numpy as jnp
from jax import lax
from jax.experimental import pallas as pl
from jax.experimental.pallas import tpu as pltpu

NHEAD = 4
LN_EPS = 1e-5
NEG_INF = -1e30


# ----------------------------- in-kernel helpers -----------------------------

def _layernorm(x, w, b):
    mu = jnp.mean(x, axis=-1, keepdims=True)
    var = jnp.mean((x - mu) ** 2, axis=-1, keepdims=True)
    return (x - mu) * lax.rsqrt(var + LN_EPS) * w + b


def _erf(x):
    # Abramowitz & Stegun 7.1.26 rational approximation, |err| < 1.5e-7.
    # TODO(synk): lax.erf lowering support in Mosaic is version-dependent; polynomial kept as the
    # portable path (FF is tiny, so the extra VPU ops are negligible).
    a1, a2, a3, a4, a5 = 0.254829592, -0.284496736, 1.421413741, -1.453152027, 1.061405429
    p = 0.3275911
    sgn = jnp.where(x >= 0.0, 1.0, -1.0)
    z = jnp.abs(x)
    t = 1.0 / (1.0 + p * z)
    poly = ((((a5 * t + a4) * t + a3) * t + a2) * t + a1) * t
    return sgn * (1.0 - poly * jnp.exp(-z * z))


def _gelu_exact(x):
    # PyTorch activation='gelu' (exact erf form).
    return 0.5 * x * (1.0 + _erf(x * 0.7071067811865476))


# --------------------------------- kernel ------------------------------------

def intention_kernel(dial_ref, intent_ref,
                     wqkv_ref, wo_ref, wl1_ref, wl2_ref,
                     bqkv_ref, vecs_ref, mask_ref,
                     out_ref):
    f32 = jnp.float32
    bf16 = jnp.bfloat16

    dial = dial_ref[...]                      # (B*S, H) f32
    intent = intent_ref[...]                  # (N, H)  f32, N == S
    BS, H = dial.shape
    S = intent.shape[0]
    B = BS // S
    E = 2 * H
    hd = E // NHEAD
    FF = wl1_ref.shape[1]

    V = vecs_ref[...]                         # (7, max(E,FF)) f32 rows: out_b, ln1_w, ln1_b,
                                              #   l1_b, l2_b, ln2_w, ln2_b (each zero-padded)
    mask = mask_ref[...]                      # (BS, BS) f32, 0 in-batch / -1e30 cross-batch
    intent_bf = intent.astype(bf16)

    # ---- intention cross-attention + concat (matmul / softmax / matmul.T / cat) ----
    # One batched score matmul, transposed layout (MXU-native "contract minor dims", no .T).
    # Logits stay f32 (they feed a softmax); softmax over axis 0 never mixes batches.
    scT = lax.dot_general(intent, dial, (((1,), (1,)), ((), ())),
                          preferred_element_type=f32)                        # (N, B*S)
    m = jnp.max(scT, axis=0, keepdims=True)
    e = jnp.exp(scT - m)
    attnT = e * pl.reciprocal(jnp.sum(e, axis=0, keepdims=True), approx=True)
    attnT_bf = attnT.astype(bf16)
    # attended[b, n, :] = sum_s attn[b, s, n] * intent[s, :]  ==  attnT[:, b-block] @ intent
    attended = jnp.concatenate(
        [jnp.dot(attnT_bf[:, b * S:(b + 1) * S], intent_bf, preferred_element_type=f32)
         for b in range(B)], axis=0)                                         # (B*S, H)
    x = jnp.concatenate([dial, attended], axis=-1)                           # (B*S, E) f32

    # ---- TransformerEncoderLayer (post-norm, eval): self-attention block ----
    # Fused QKV (one MXU push), block-diagonal attention on flat (BS, *) tensors, single out-proj.
    x_bf = x.astype(bf16)
    qkv = jnp.dot(x_bf, wqkv_ref[...], preferred_element_type=f32) + bqkv_ref[...]  # (BS, 3E)
    qkv_bf = qkv.astype(bf16)                                                # q-scale pre-folded
    heads = []
    for h in range(NHEAD):
        q = qkv_bf[:, h * hd:(h + 1) * hd]                                   # (BS, hd)
        k = qkv_bf[:, E + h * hd:E + (h + 1) * hd]
        v = qkv_bf[:, 2 * E + h * hd:2 * E + (h + 1) * hd]
        s = lax.dot_general(q, k, (((1,), (1,)), ((), ())),
                            preferred_element_type=f32) + mask               # (BS, BS)
        sm = jnp.max(s, axis=-1, keepdims=True)
        p = jnp.exp(s - sm)
        p = p * pl.reciprocal(jnp.sum(p, axis=-1, keepdims=True), approx=True)
        heads.append(jnp.dot(p.astype(bf16), v, preferred_element_type=f32)) # (BS, hd)
    o_cat = jnp.concatenate(heads, axis=-1).astype(bf16)                     # (BS, E)
    attn_out = jnp.dot(o_cat, wo_ref[...], preferred_element_type=f32) + V[0:1, :E]
    x = _layernorm(x + attn_out, V[1:2, :E], V[2:3, :E])

    # ---- TransformerEncoderLayer: feed-forward block ----
    h1 = jnp.dot(x.astype(bf16), wl1_ref[...], preferred_element_type=f32) + V[3:4, :FF]
    h1 = _gelu_exact(h1)
    h2 = jnp.dot(h1.astype(bf16), wl2_ref[...], preferred_element_type=f32) + V[4:5, :E]
    x = _layernorm(x + h2, V[5:6, :E], V[6:7, :E])

    # ---- mean over sequence per batch (== encoded.mean(dim=0) after the torch transpose) ----
    # Lane-dense (1, B*E) store; wrapper reshapes back to (B, E).
    means = [jnp.mean(x[b * S:(b + 1) * S, :], axis=0, keepdims=True) for b in range(B)]
    out_ref[...] = jnp.concatenate(means, axis=-1)                           # (1, B*E)


# --------------------------------- wrapper -----------------------------------

def intention_extractor(dial, intent, params):
    """dial: (B, S, H) f32, intent: (N, H) f32 with N == S.  Returns (B, 2H) f32."""
    (in_w, in_b, out_w, out_b, ln1_w, ln1_b,
     l1_w, l1_b, l2_w, l2_b, ln2_w, ln2_b) = params
    B, S, H = dial.shape
    N = intent.shape[0]
    assert N == S, "module semantics require num_intentions == seq_len"
    E = 2 * H
    FF = l1_w.shape[0]
    assert E % NHEAD == 0
    hd = E // NHEAD
    scale = float(hd) ** -0.5
    bf16 = jnp.bfloat16
    f32 = jnp.float32

    # Wrapper-side glue (layout plumbing, not compute-hoisting):
    #   * one lane-dense fused QKV weight slab (q-scale folded in before the bf16 cast),
    #   * single bf16 out-proj / FF weights,
    #   * one packed f32 slab for all bias / LayerNorm vectors (padded to max(E, FF)),
    #   * block-diagonal -inf mask so self-attention never mixes batches.
    w_qkv = jnp.concatenate([in_w[:E].T * scale, in_w[E:2 * E].T, in_w[2 * E:].T],
                            axis=1).astype(bf16)                             # (E, 3E)
    b_qkv = jnp.concatenate([in_b[:E] * scale, in_b[E:2 * E], in_b[2 * E:]]
                            ).reshape(1, 3 * E).astype(f32)                  # (1, 3E)
    w_o = out_w.T.astype(bf16)                                               # (E, E)
    w_l1 = l1_w.T.astype(bf16)                                               # (E, FF)
    w_l2 = l2_w.T.astype(bf16)                                               # (FF, E)
    Emax = max(E, FF)
    padv = lambda v: jnp.pad(v, (0, Emax - v.shape[0]))
    vecs = jnp.stack([padv(out_b), padv(ln1_w), padv(ln1_b), padv(l1_b),
                      padv(l2_b), padv(ln2_w), padv(ln2_b)]).astype(f32)     # (7, Emax)
    bidx = jnp.arange(B * S) // S
    mask = jnp.where(bidx[:, None] == bidx[None, :], 0.0, NEG_INF).astype(f32)   # (BS, BS)

    vmem = pl.BlockSpec(memory_space=pltpu.MemorySpace.VMEM)                 # whole-array resident
    args = (dial.reshape(B * S, H), intent, w_qkv, w_o, w_l1, w_l2, b_qkv, vecs, mask)

    out = pl.pallas_call(
        intention_kernel,
        out_shape=jax.ShapeDtypeStruct((1, B * E), jnp.float32),
        in_specs=[vmem] * len(args),
        out_specs=vmem,
    )(*args)
    return out.reshape(B, E)


# ----------------------------- pure-JAX reference ----------------------------

def reference(dial, intent, params, matmul_dtype=jnp.float32):
    """Pure-JAX reference.  matmul_dtype=bfloat16 mirrors the kernel's MXU-operand policy
    (bf16 operands, f32 accumulation; cross-attention logits always f32)."""
    (in_w, in_b, out_w, out_b, ln1_w, ln1_b,
     l1_w, l1_b, l2_w, l2_b, ln2_w, ln2_b) = params
    B, S, H = dial.shape
    E = 2 * H
    hd = E // NHEAD
    f32 = jnp.float32
    c = lambda t: t.astype(matmul_dtype)
    mm = dict(preferred_element_type=f32, precision=lax.Precision.HIGHEST)

    scores = jnp.einsum('bsh,nh->bsn', dial, intent, **mm)          # logits stay f32 (see kernel)
    attn = jax.nn.softmax(scores, axis=-1)
    attended = jnp.einsum('bsn,sh->bnh', c(attn), c(intent), **mm)
    x = jnp.concatenate([dial, attended], axis=-1)                  # (B, S, E)

    qkv = jnp.einsum('bse,fe->bsf', c(x), c(in_w), **mm) + in_b
    q, k, v = qkv[..., :E], qkv[..., E:2 * E], qkv[..., 2 * E:]
    sp = lambda t: t.reshape(B, S, NHEAD, hd)
    qh = sp(q) * (float(hd) ** -0.5)
    kh, vh = sp(k), sp(v)
    s = jnp.einsum('bqnd,bknd->bnqk', c(qh), c(kh), **mm)
    p = jax.nn.softmax(s, axis=-1)
    o = jnp.einsum('bnqk,bknd->bqnd', c(p), c(vh), **mm).reshape(B, S, E)
    o = jnp.einsum('bse,fe->bsf', c(o), c(out_w), **mm) + out_b

    def ln(y, w, b):
        mu = y.mean(-1, keepdims=True)
        var = ((y - mu) ** 2).mean(-1, keepdims=True)
        return (y - mu) * lax.rsqrt(var + LN_EPS) * w + b

    x = ln(x + o, ln1_w, ln1_b)
    hf = jnp.einsum('bse,fe->bsf', c(x), c(l1_w), **mm) + l1_b
    hf = jax.nn.gelu(hf, approximate=False)
    h2 = jnp.einsum('bsf,ef->bse', c(hf), c(l2_w), **mm) + l2_b
    x = ln(x + h2, ln2_w, ln2_b)
    return x.mean(axis=1)


# ----------------------------------- main ------------------------------------

if __name__ == "__main__":
    # Shapes consistent with the module: hidden_dim=32, num_intentions == seq_len = 8,
    # input_dim = d_model = 2*hidden_dim = 64 (divisible by nhead=4), dim_feedforward=32, batch=2.
    B, S, H = 2, 8, 32
    N = S
    E = 2 * H
    FF = H

    key = jax.random.PRNGKey(0)
    ks = jax.random.split(key, 16)
    f32 = jnp.float32

    dial = jax.random.normal(ks[0], (B, S, H), f32)
    intent = jax.random.normal(ks[1], (N, H), f32)

    params = (
        0.1 * jax.random.normal(ks[2], (3 * E, E), f32),   # self_attn.in_proj_weight
        0.1 * jax.random.normal(ks[3], (3 * E,), f32),     # self_attn.in_proj_bias
        0.1 * jax.random.normal(ks[4], (E, E), f32),       # self_attn.out_proj.weight
        0.1 * jax.random.normal(ks[5], (E,), f32),         # self_attn.out_proj.bias
        1.0 + 0.1 * jax.random.normal(ks[6], (E,), f32),   # norm1.weight
        0.1 * jax.random.normal(ks[7], (E,), f32),         # norm1.bias
        0.1 * jax.random.normal(ks[8], (FF, E), f32),      # linear1.weight
        0.1 * jax.random.normal(ks[9], (FF,), f32),        # linear1.bias
        0.1 * jax.random.normal(ks[10], (E, FF), f32),     # linear2.weight
        0.1 * jax.random.normal(ks[11], (E,), f32),        # linear2.bias
        1.0 + 0.1 * jax.random.normal(ks[12], (E,), f32),  # norm2.weight
        0.1 * jax.random.normal(ks[13], (E,), f32),        # norm2.bias
    )

    out = jax.block_until_ready(intention_extractor(dial, intent, params))
    assert out.shape == (B, E), out.shape

    # Tight check vs a reference using the SAME mixed precision (validates kernel math/structure);
    # loose check vs the pure-f32 reference bounds the loss from the bf16 MXU operand policy.
    ref_mix = jax.block_until_ready(reference(dial, intent, params, jnp.bfloat16))
    ref_f32 = jax.block_until_ready(reference(dial, intent, params, jnp.float32))
    err_mix = float(jnp.max(jnp.abs(out - ref_mix)))
    err_f32 = float(jnp.max(jnp.abs(out - ref_f32)))
    assert err_mix < 1e-2, f"kernel vs mixed-precision reference mismatch, max abs err = {err_mix}"
    assert err_f32 < 5e-2, f"kernel vs float32 reference mismatch, max abs err = {err_f32}"
    print("KERNEL_OK")
</pallas_src>

<mosaic_0001>
module attributes {stable_mosaic.version = 11 : i64} {
  func.func @intention_kernel(%arg0: memref<16x32xf32, #tpu.memory_space<vmem>>, %arg1: memref<8x32xf32, #tpu.memory_space<vmem>>, %arg2: memref<64x192xbf16, #tpu.memory_space<vmem>>, %arg3: memref<64x64xbf16, #tpu.memory_space<vmem>>, %arg4: memref<64x32xbf16, #tpu.memory_space<vmem>>, %arg5: memref<32x64xbf16, #tpu.memory_space<vmem>>, %arg6: memref<1x192xf32, #tpu.memory_space<vmem>>, %arg7: memref<7x64xf32, #tpu.memory_space<vmem>>, %arg8: memref<16x16xf32, #tpu.memory_space<vmem>>, %arg9: memref<1x128xf32, #tpu.memory_space<vmem>>) attributes {dimension_semantics = [], scalar_prefetch = 0 : i64, scratch_operands = 0 : i64, tpu.core_type = #tpu.core_type<tc>} {
    %c0 = arith.constant 0 : index
    %c0_0 = arith.constant 0 : index
    %0 = vector.load %arg0[%c0, %c0_0] : memref<16x32xf32, #tpu.memory_space<vmem>>, vector<16x32xf32>
    %c0_1 = arith.constant 0 : index
    %c0_2 = arith.constant 0 : index
    %1 = vector.load %arg1[%c0_1, %c0_2] : memref<8x32xf32, #tpu.memory_space<vmem>>, vector<8x32xf32>
    %c0_3 = arith.constant 0 : index
    %c0_4 = arith.constant 0 : index
    %2 = vector.load %arg7[%c0_3, %c0_4] : memref<7x64xf32, #tpu.memory_space<vmem>>, vector<7x64xf32>
    %c0_5 = arith.constant 0 : index
    %c0_6 = arith.constant 0 : index
    %3 = vector.load %arg8[%c0_5, %c0_6] : memref<16x16xf32, #tpu.memory_space<vmem>>, vector<16x16xf32>
    %4 = arith.truncf %1 : vector<8x32xf32> to vector<8x32xbf16>
    %cst = arith.constant dense<0.000000e+00> : vector<8x16xf32>
    %5 = tpu.matmul %1, %0, %cst {dimension_numbers = #tpu.dot_dimension_numbers<[1], [1], [0], [0], [0, 0, 1, 0], [], []>} : vector<8x32xf32>, vector<16x32xf32>, vector<8x16xf32> -> vector<8x16xf32>
    %cst_7 = arith.constant dense<0xFF800000> : vector<16xf32>
    %6 = vector.multi_reduction <maximumf>, %5, %cst_7 [0] : vector<8x16xf32> to vector<16xf32>
    %7 = vector.shape_cast %6 : vector<16xf32> to vector<1x16xf32>
    %8 = vector.broadcast %7 : vector<1x16xf32> to vector<8x16xf32>
    %9 = arith.subf %5, %8 : vector<8x16xf32>
    %10 = math.exp %9 : vector<8x16xf32>
    %cst_8 = arith.constant dense<0.000000e+00> : vector<16xf32>
    %11 = vector.multi_reduction <add>, %10, %cst_8 [0] : vector<8x16xf32> to vector<16xf32>
    %12 = vector.shape_cast %11 : vector<16xf32> to vector<1x16xf32>
    %13 = tpu.reciprocal %12 {approx = true} : vector<1x16xf32> -> vector<1x16xf32>
    %14 = vector.broadcast %13 : vector<1x16xf32> to vector<8x16xf32>
    %15 = arith.mulf %10, %14 : vector<8x16xf32>
    %16 = arith.truncf %15 : vector<8x16xf32> to vector<8x16xbf16>
    %17 = vector.extract_strided_slice %16 {offsets = [0, 0], sizes = [8, 8], strides = [1, 1]} : vector<8x16xbf16> to vector<8x8xbf16>
    %cst_9 = arith.constant dense<0.000000e+00> : vector<8x32xf32>
    %18 = tpu.matmul %17, %4, %cst_9 {dimension_numbers = #tpu.dot_dimension_numbers<[1], [0], [0], [1], [0, 0, 1, 1], [], []>} : vector<8x8xbf16>, vector<8x32xbf16>, vector<8x32xf32> -> vector<8x32xf32>
    %19 = vector.extract_strided_slice %16 {offsets = [0, 8], sizes = [8, 8], strides = [1, 1]} : vector<8x16xbf16> to vector<8x8xbf16>
    %cst_10 = arith.constant dense<0.000000e+00> : vector<8x32xf32>
    %20 = tpu.matmul %19, %4, %cst_10 {dimension_numbers = #tpu.dot_dimension_numbers<[1], [0], [0], [1], [0, 0, 1, 1], [], []>} : vector<8x8xbf16>, vector<8x32xbf16>, vector<8x32xf32> -> vector<8x32xf32>
    %21 = tpu.concatenate %18, %20 in 0 : vector<8x32xf32>, vector<8x32xf32> -> vector<16x32xf32>
    %22 = tpu.concatenate %0, %21 in 1 : vector<16x32xf32>, vector<16x32xf32> -> vector<16x64xf32>
    %23 = arith.truncf %22 : vector<16x64xf32> to vector<16x64xbf16>
    %c0_11 = arith.constant 0 : index
    %c0_12 = arith.constant 0 : index
    %24 = vector.load %arg2[%c0_11, %c0_12] : memref<64x192xbf16, #tpu.memory_space<vmem>>, vector<64x192xbf16>
    %cst_13 = arith.constant dense<0.000000e+00> : vector<16x192xf32>
    %25 = tpu.matmul %23, %24, %cst_13 {dimension_numbers = #tpu.dot_dimension_numbers<[1], [0], [0], [1], [0, 0, 1, 1], [], []>} : vector<16x64xbf16>, vector<64x192xbf16>, vector<16x192xf32> -> vector<16x192xf32>
    %c0_14 = arith.constant 0 : index
    %c0_15 = arith.constant 0 : index
    %26 = vector.load %arg6[%c0_14, %c0_15] : memref<1x192xf32, #tpu.memory_space<vmem>>, vector<1x192xf32>
    %27 = vector.broadcast %26 : vector<1x192xf32> to vector<16x192xf32>
    %28 = arith.addf %25, %27 : vector<16x192xf32>
    %29 = arith.truncf %28 : vector<16x192xf32> to vector<16x192xbf16>
    %30 = vector.extract_strided_slice %29 {offsets = [0, 0], sizes = [16, 16], strides = [1, 1]} : vector<16x192xbf16> to vector<16x16xbf16>
    %31 = vector.extract_strided_slice %29 {offsets = [0, 64], sizes = [16, 16], strides = [1, 1]} : vector<16x192xbf16> to vector<16x16xbf16>
    %32 = vector.extract_strided_slice %29 {offsets = [0, 128], sizes = [16, 16], strides = [1, 1]} : vector<16x192xbf16> to vector<16x16xbf16>
    %cst_16 = arith.constant dense<0.000000e+00> : vector<16x16xf32>
    %33 = tpu.matmul %30, %31, %cst_16 {dimension_numbers = #tpu.dot_dimension_numbers<[1], [1], [0], [0], [0, 0, 1, 0], [], []>} : vector<16x16xbf16>, vector<16x16xbf16>, vector<16x16xf32> -> vector<16x16xf32>
    %34 = arith.addf %33, %3 : vector<16x16xf32>
    %cst_17 = arith.constant dense<0xFF800000> : vector<16xf32>
    %35 = vector.multi_reduction <maximumf>, %34, %cst_17 [1] : vector<16x16xf32> to vector<16xf32>
    %36 = vector.shape_cast %35 : vector<16xf32> to vector<16x1xf32>
    %37 = vector.broadcast %36 : vector<16x1xf32> to vector<16x16xf32>
    %38 = arith.subf %34, %37 : vector<16x16xf32>
    %39 = math.exp %38 : vector<16x16xf32>
    %cst_18 = arith.constant dense<0.000000e+00> : vector<16xf32>
    %40 = vector.multi_reduction <add>, %39, %cst_18 [1] : vector<16x16xf32> to vector<16xf32>
    %41 = vector.shape_cast %40 : vector<16xf32> to vector<16x1xf32>
    %42 = tpu.reciprocal %41 {approx = true} : vector<16x1xf32> -> vector<16x1xf32>
    %43 = vector.broadcast %42 : vector<16x1xf32> to vector<16x16xf32>
    %44 = arith.mulf %39, %43 : vector<16x16xf32>
    %45 = arith.truncf %44 : vector<16x16xf32> to vector<16x16xbf16>
    %cst_19 = arith.constant dense<0.000000e+00> : vector<16x16xf32>
    %46 = tpu.matmul %45, %32, %cst_19 {dimension_numbers = #tpu.dot_dimension_numbers<[1], [0], [0], [1], [0, 0, 1, 1], [], []>} : vector<16x16xbf16>, vector<16x16xbf16>, vector<16x16xf32> -> vector<16x16xf32>
    %47 = vector.extract_strided_slice %29 {offsets = [0, 16], sizes = [16, 16], strides = [1, 1]} : vector<16x192xbf16> to vector<16x16xbf16>
    %48 = vector.extract_strided_slice %29 {offsets = [0, 80], sizes = [16, 16], strides = [1, 1]} : vector<16x192xbf16> to vector<16x16xbf16>
    %49 = vector.extract_strided_slice %29 {offsets = [0, 144], sizes = [16, 16], strides = [1, 1]} : vector<16x192xbf16> to vector<16x16xbf16>
    %cst_20 = arith.constant dense<0.000000e+00> : vector<16x16xf32>
    %50 = tpu.matmul %47, %48, %cst_20 {dimension_numbers = #tpu.dot_dimension_numbers<[1], [1], [0], [0], [0, 0, 1, 0], [], []>} : vector<16x16xbf16>, vector<16x16xbf16>, vector<16x16xf32> -> vector<16x16xf32>
    %51 = arith.addf %50, %3 : vector<16x16xf32>
    %cst_21 = arith.constant dense<0xFF800000> : vector<16xf32>
    %52 = vector.multi_reduction <maximumf>, %51, %cst_21 [1] : vector<16x16xf32> to vector<16xf32>
    %53 = vector.shape_cast %52 : vector<16xf32> to vector<16x1xf32>
    %54 = vector.broadcast %53 : vector<16x1xf32> to vector<16x16xf32>
    %55 = arith.subf %51, %54 : vector<16x16xf32>
    %56 = math.exp %55 : vector<16x16xf32>
    %cst_22 = arith.constant dense<0.000000e+00> : vector<16xf32>
    %57 = vector.multi_reduction <add>, %56, %cst_22 [1] : vector<16x16xf32> to vector<16xf32>
    %58 = vector.shape_cast %57 : vector<16xf32> to vector<16x1xf32>
    %59 = tpu.reciprocal %58 {approx = true} : vector<16x1xf32> -> vector<16x1xf32>
    %60 = vector.broadcast %59 : vector<16x1xf32> to vector<16x16xf32>
    %61 = arith.mulf %56, %60 : vector<16x16xf32>
    %62 = arith.truncf %61 : vector<16x16xf32> to vector<16x16xbf16>
    %cst_23 = arith.constant dense<0.000000e+00> : vector<16x16xf32>
    %63 = tpu.matmul %62, %49, %cst_23 {dimension_numbers = #tpu.dot_dimension_numbers<[1], [0], [0], [1], [0, 0, 1, 1], [], []>} : vector<16x16xbf16>, vector<16x16xbf16>, vector<16x16xf32> -> vector<16x16xf32>
    %64 = vector.extract_strided_slice %29 {offsets = [0, 32], sizes = [16, 16], strides = [1, 1]} : vector<16x192xbf16> to vector<16x16xbf16>
    %65 = vector.extract_strided_slice %29 {offsets = [0, 96], sizes = [16, 16], strides = [1, 1]} : vector<16x192xbf16> to vector<16x16xbf16>
    %66 = vector.extract_strided_slice %29 {offsets = [0, 160], sizes = [16, 16], strides = [1, 1]} : vector<16x192xbf16> to vector<16x16xbf16>
    %cst_24 = arith.constant dense<0.000000e+00> : vector<16x16xf32>
    %67 = tpu.matmul %64, %65, %cst_24 {dimension_numbers = #tpu.dot_dimension_numbers<[1], [1], [0], [0], [0, 0, 1, 0], [], []>} : vector<16x16xbf16>, vector<16x16xbf16>, vector<16x16xf32> -> vector<16x16xf32>
    %68 = arith.addf %67, %3 : vector<16x16xf32>
    %cst_25 = arith.constant dense<0xFF800000> : vector<16xf32>
    %69 = vector.multi_reduction <maximumf>, %68, %cst_25 [1] : vector<16x16xf32> to vector<16xf32>
    %70 = vector.shape_cast %69 : vector<16xf32> to vector<16x1xf32>
    %71 = vector.broadcast %70 : vector<16x1xf32> to vector<16x16xf32>
    %72 = arith.subf %68, %71 : vector<16x16xf32>
    %73 = math.exp %72 : vector<16x16xf32>
    %cst_26 = arith.constant dense<0.000000e+00> : vector<16xf32>
    %74 = vector.multi_reduction <add>, %73, %cst_26 [1] : vector<16x16xf32> to vector<16xf32>
    %75 = vector.shape_cast %74 : vector<16xf32> to vector<16x1xf32>
    %76 = tpu.reciprocal %75 {approx = true} : vector<16x1xf32> -> vector<16x1xf32>
    %77 = vector.broadcast %76 : vector<16x1xf32> to vector<16x16xf32>
    %78 = arith.mulf %73, %77 : vector<16x16xf32>
    %79 = arith.truncf %78 : vector<16x16xf32> to vector<16x16xbf16>
    %cst_27 = arith.constant dense<0.000000e+00> : vector<16x16xf32>
    %80 = tpu.matmul %79, %66, %cst_27 {dimension_numbers = #tpu.dot_dimension_numbers<[1], [0], [0], [1], [0, 0, 1, 1], [], []>} : vector<16x16xbf16>, vector<16x16xbf16>, vector<16x16xf32> -> vector<16x16xf32>
    %81 = vector.extract_strided_slice %29 {offsets = [0, 48], sizes = [16, 16], strides = [1, 1]} : vector<16x192xbf16> to vector<16x16xbf16>
    %82 = vector.extract_strided_slice %29 {offsets = [0, 112], sizes = [16, 16], strides = [1, 1]} : vector<16x192xbf16> to vector<16x16xbf16>
    %83 = vector.extract_strided_slice %29 {offsets = [0, 176], sizes = [16, 16], strides = [1, 1]} : vector<16x192xbf16> to vector<16x16xbf16>
    %cst_28 = arith.constant dense<0.000000e+00> : vector<16x16xf32>
    %84 = tpu.matmul %81, %82, %cst_28 {dimension_numbers = #tpu.dot_dimension_numbers<[1], [1], [0], [0], [0, 0, 1, 0], [], []>} : vector<16x16xbf16>, vector<16x16xbf16>, vector<16x16xf32> -> vector<16x16xf32>
    %85 = arith.addf %84, %3 : vector<16x16xf32>
    %cst_29 = arith.constant dense<0xFF800000> : vector<16xf32>
    %86 = vector.multi_reduction <maximumf>, %85, %cst_29 [1] : vector<16x16xf32> to vector<16xf32>
    %87 = vector.shape_cast %86 : vector<16xf32> to vector<16x1xf32>
    %88 = vector.broadcast %87 : vector<16x1xf32> to vector<16x16xf32>
    %89 = arith.subf %85, %88 : vector<16x16xf32>
    %90 = math.exp %89 : vector<16x16xf32>
    %cst_30 = arith.constant dense<0.000000e+00> : vector<16xf32>
    %91 = vector.multi_reduction <add>, %90, %cst_30 [1] : vector<16x16xf32> to vector<16xf32>
    %92 = vector.shape_cast %91 : vector<16xf32> to vector<16x1xf32>
    %93 = tpu.reciprocal %92 {approx = true} : vector<16x1xf32> -> vector<16x1xf32>
    %94 = vector.broadcast %93 : vector<16x1xf32> to vector<16x16xf32>
    %95 = arith.mulf %90, %94 : vector<16x16xf32>
    %96 = arith.truncf %95 : vector<16x16xf32> to vector<16x16xbf16>
    %cst_31 = arith.constant dense<0.000000e+00> : vector<16x16xf32>
    %97 = tpu.matmul %96, %83, %cst_31 {dimension_numbers = #tpu.dot_dimension_numbers<[1], [0], [0], [1], [0, 0, 1, 1], [], []>} : vector<16x16xbf16>, vector<16x16xbf16>, vector<16x16xf32> -> vector<16x16xf32>
    %98 = tpu.concatenate %46, %63, %80, %97 in 1 : vector<16x16xf32>, vector<16x16xf32>, vector<16x16xf32>, vector<16x16xf32> -> vector<16x64xf32>
    %99 = arith.truncf %98 : vector<16x64xf32> to vector<16x64xbf16>
    %c0_32 = arith.constant 0 : index
    %c0_33 = arith.constant 0 : index
    %100 = vector.load %arg3[%c0_32, %c0_33] : memref<64x64xbf16, #tpu.memory_space<vmem>>, vector<64x64xbf16>
    %cst_34 = arith.constant dense<0.000000e+00> : vector<16x64xf32>
    %101 = tpu.matmul %99, %100, %cst_34 {dimension_numbers = #tpu.dot_dimension_numbers<[1], [0], [0], [1], [0, 0, 1, 1], [], []>} : vector<16x64xbf16>, vector<64x64xbf16>, vector<16x64xf32> -> vector<16x64xf32>
    %102 = vector.extract_strided_slice %2 {offsets = [0, 0], sizes = [1, 64], strides = [1, 1]} : vector<7x64xf32> to vector<1x64xf32>
    %103 = vector.broadcast %102 : vector<1x64xf32> to vector<16x64xf32>
    %104 = arith.addf %101, %103 : vector<16x64xf32>
    %105 = arith.addf %22, %104 : vector<16x64xf32>
    %106 = vector.extract_strided_slice %2 {offsets = [1, 0], sizes = [1, 64], strides = [1, 1]} : vector<7x64xf32> to vector<1x64xf32>
    %107 = vector.extract_strided_slice %2 {offsets = [2, 0], sizes = [1, 64], strides = [1, 1]} : vector<7x64xf32> to vector<1x64xf32>
    %cst_35 = arith.constant dense<0.000000e+00> : vector<16xf32>
    %108 = vector.multi_reduction <add>, %105, %cst_35 [1] : vector<16x64xf32> to vector<16xf32>
    %109 = vector.shape_cast %108 : vector<16xf32> to vector<16x1xf32>
    %cst_36 = arith.constant 6.400000e+01 : f32
    %110 = vector.broadcast %cst_36 : f32 to vector<16x1xf32>
    %111 = arith.divf %109, %110 : vector<16x1xf32>
    %112 = vector.broadcast %111 : vector<16x1xf32> to vector<16x64xf32>
    %113 = arith.subf %105, %112 : vector<16x64xf32>
    %114 = arith.mulf %113, %113 : vector<16x64xf32>
    %cst_37 = arith.constant dense<0.000000e+00> : vector<16xf32>
    %115 = vector.multi_reduction <add>, %114, %cst_37 [1] : vector<16x64xf32> to vector<16xf32>
    %116 = vector.shape_cast %115 : vector<16xf32> to vector<16x1xf32>
    %cst_38 = arith.constant 6.400000e+01 : f32
    %117 = vector.broadcast %cst_38 : f32 to vector<16x1xf32>
    %118 = arith.divf %116, %117 : vector<16x1xf32>
    %119 = vector.broadcast %111 : vector<16x1xf32> to vector<16x64xf32>
    %120 = arith.subf %105, %119 : vector<16x64xf32>
    %cst_39 = arith.constant 9.99999974E-6 : f32
    %121 = vector.broadcast %cst_39 : f32 to vector<16x1xf32>
    %122 = arith.addf %118, %121 : vector<16x1xf32>
    %123 = math.rsqrt %122 : vector<16x1xf32>
    %124 = vector.broadcast %123 : vector<16x1xf32> to vector<16x64xf32>
    %125 = arith.mulf %120, %124 : vector<16x64xf32>
    %126 = vector.broadcast %106 : vector<1x64xf32> to vector<16x64xf32>
    %127 = arith.mulf %125, %126 : vector<16x64xf32>
    %128 = vector.broadcast %107 : vector<1x64xf32> to vector<16x64xf32>
    %129 = arith.addf %127, %128 : vector<16x64xf32>
    %130 = arith.truncf %129 : vector<16x64xf32> to vector<16x64xbf16>
    %c0_40 = arith.constant 0 : index
    %c0_41 = arith.constant 0 : index
    %131 = vector.load %arg4[%c0_40, %c0_41] : memref<64x32xbf16, #tpu.memory_space<vmem>>, vector<64x32xbf16>
    %cst_42 = arith.constant dense<0.000000e+00> : vector<16x32xf32>
    %132 = tpu.matmul %130, %131, %cst_42 {dimension_numbers = #tpu.dot_dimension_numbers<[1], [0], [0], [1], [0, 0, 1, 1], [], []>} : vector<16x64xbf16>, vector<64x32xbf16>, vector<16x32xf32> -> vector<16x32xf32>
    %133 = vector.extract_strided_slice %2 {offsets = [3, 0], sizes = [1, 32], strides = [1, 1]} : vector<7x64xf32> to vector<1x32xf32>
    %134 = vector.broadcast %133 : vector<1x32xf32> to vector<16x32xf32>
    %135 = arith.addf %132, %134 : vector<16x32xf32>
    %cst_43 = arith.constant 5.000000e-01 : f32
    %136 = vector.broadcast %cst_43 : f32 to vector<16x32xf32>
    %137 = arith.mulf %136, %135 : vector<16x32xf32>
    %cst_44 = arith.constant 0.707106769 : f32
    %138 = vector.broadcast %cst_44 : f32 to vector<16x32xf32>
    %139 = arith.mulf %135, %138 : vector<16x32xf32>
    %cst_45 = arith.constant 0.000000e+00 : f32
    %140 = vector.broadcast %cst_45 : f32 to vector<16x32xf32>
    %141 = arith.cmpf oge, %139, %140 : vector<16x32xf32>
    %cst_46 = arith.constant 1.000000e+00 : f32
    %cst_47 = arith.constant -1.000000e+00 : f32
    %142 = vector.broadcast %cst_46 : f32 to vector<16x32xf32>
    %143 = vector.broadcast %cst_47 : f32 to vector<16x32xf32>
    %144 = arith.select %141, %142, %143 : vector<16x32xi1>, vector<16x32xf32>
    %145 = math.absf %139 : vector<16x32xf32>
    %cst_48 = arith.constant 0.327591091 : f32
    %146 = vector.broadcast %cst_48 : f32 to vector<16x32xf32>
    %147 = arith.mulf %146, %145 : vector<16x32xf32>
    %cst_49 = arith.constant 1.000000e+00 : f32
    %148 = vector.broadcast %cst_49 : f32 to vector<16x32xf32>
    %149 = arith.addf %148, %147 : vector<16x32xf32>
    %cst_50 = arith.constant 1.000000e+00 : f32
    %150 = vector.broadcast %cst_50 : f32 to vector<16x32xf32>
    %151 = arith.divf %150, %149 : vector<16x32xf32>
    %cst_51 = arith.constant 1.06140542 : f32
    %152 = vector.broadcast %cst_51 : f32 to vector<16x32xf32>
    %153 = arith.mulf %152, %151 : vector<16x32xf32>
    %cst_52 = arith.constant -1.45315206 : f32
    %154 = vector.broadcast %cst_52 : f32 to vector<16x32xf32>
    %155 = arith.addf %153, %154 : vector<16x32xf32>
    %156 = arith.mulf %155, %151 : vector<16x32xf32>
    %cst_53 = arith.constant 1.42141378 : f32
    %157 = vector.broadcast %cst_53 : f32 to vector<16x32xf32>
    %158 = arith.addf %156, %157 : vector<16x32xf32>
    %159 = arith.mulf %158, %151 : vector<16x32xf32>
    %cst_54 = arith.constant -0.284496725 : f32
    %160 = vector.broadcast %cst_54 : f32 to vector<16x32xf32>
    %161 = arith.addf %159, %160 : vector<16x32xf32>
    %162 = arith.mulf %161, %151 : vector<16x32xf32>
    %cst_55 = arith.constant 0.254829586 : f32
    %163 = vector.broadcast %cst_55 : f32 to vector<16x32xf32>
    %164 = arith.addf %162, %163 : vector<16x32xf32>
    %165 = arith.mulf %164, %151 : vector<16x32xf32>
    %cst_56 = arith.constant 0.000000e+00 : f32
    %166 = vector.broadcast %cst_56 : f32 to vector<16x32xf32>
    %167 = arith.subf %166, %145 : vector<16x32xf32>
    %168 = arith.mulf %167, %145 : vector<16x32xf32>
    %169 = math.exp %168 : vector<16x32xf32>
    %170 = arith.mulf %165, %169 : vector<16x32xf32>
    %cst_57 = arith.constant 1.000000e+00 : f32
    %171 = vector.broadcast %cst_57 : f32 to vector<16x32xf32>
    %172 = arith.subf %171, %170 : vector<16x32xf32>
    %173 = arith.mulf %144, %172 : vector<16x32xf32>
    %cst_58 = arith.constant 1.000000e+00 : f32
    %174 = vector.broadcast %cst_58 : f32 to vector<16x32xf32>
    %175 = arith.addf %174, %173 : vector<16x32xf32>
    %176 = arith.mulf %137, %175 : vector<16x32xf32>
    %177 = arith.truncf %176 : vector<16x32xf32> to vector<16x32xbf16>
    %c0_59 = arith.constant 0 : index
    %c0_60 = arith.constant 0 : index
    %178 = vector.load %arg5[%c0_59, %c0_60] : memref<32x64xbf16, #tpu.memory_space<vmem>>, vector<32x64xbf16>
    %cst_61 = arith.constant dense<0.000000e+00> : vector<16x64xf32>
    %179 = tpu.matmul %177, %178, %cst_61 {dimension_numbers = #tpu.dot_dimension_numbers<[1], [0], [0], [1], [0, 0, 1, 1], [], []>} : vector<16x32xbf16>, vector<32x64xbf16>, vector<16x64xf32> -> vector<16x64xf32>
    %180 = vector.extract_strided_slice %2 {offsets = [4, 0], sizes = [1, 64], strides = [1, 1]} : vector<7x64xf32> to vector<1x64xf32>
    %181 = vector.broadcast %180 : vector<1x64xf32> to vector<16x64xf32>
    %182 = arith.addf %179, %181 : vector<16x64xf32>
    %183 = arith.addf %129, %182 : vector<16x64xf32>
    %184 = vector.extract_strided_slice %2 {offsets = [5, 0], sizes = [1, 64], strides = [1, 1]} : vector<7x64xf32> to vector<1x64xf32>
    %185 = vector.extract_strided_slice %2 {offsets = [6, 0], sizes = [1, 64], strides = [1, 1]} : vector<7x64xf32> to vector<1x64xf32>
    %cst_62 = arith.constant dense<0.000000e+00> : vector<16xf32>
    %186 = vector.multi_reduction <add>, %183, %cst_62 [1] : vector<16x64xf32> to vector<16xf32>
    %187 = vector.shape_cast %186 : vector<16xf32> to vector<16x1xf32>
    %cst_63 = arith.constant 6.400000e+01 : f32
    %188 = vector.broadcast %cst_63 : f32 to vector<16x1xf32>
    %189 = arith.divf %187, %188 : vector<16x1xf32>
    %190 = vector.broadcast %189 : vector<16x1xf32> to vector<16x64xf32>
    %191 = arith.subf %183, %190 : vector<16x64xf32>
    %192 = arith.mulf %191, %191 : vector<16x64xf32>
    %cst_64 = arith.constant dense<0.000000e+00> : vector<16xf32>
    %193 = vector.multi_reduction <add>, %192, %cst_64 [1] : vector<16x64xf32> to vector<16xf32>
    %194 = vector.shape_cast %193 : vector<16xf32> to vector<16x1xf32>
    %cst_65 = arith.constant 6.400000e+01 : f32
    %195 = vector.broadcast %cst_65 : f32 to vector<16x1xf32>
    %196 = arith.divf %194, %195 : vector<16x1xf32>
    %197 = vector.broadcast %189 : vector<16x1xf32> to vector<16x64xf32>
    %198 = arith.subf %183, %197 : vector<16x64xf32>
    %cst_66 = arith.constant 9.99999974E-6 : f32
    %199 = vector.broadcast %cst_66 : f32 to vector<16x1xf32>
    %200 = arith.addf %196, %199 : vector<16x1xf32>
    %201 = math.rsqrt %200 : vector<16x1xf32>
    %202 = vector.broadcast %201 : vector<16x1xf32> to vector<16x64xf32>
    %203 = arith.mulf %198, %202 : vector<16x64xf32>
    %204 = vector.broadcast %184 : vector<1x64xf32> to vector<16x64xf32>
    %205 = arith.mulf %203, %204 : vector<16x64xf32>
    %206 = vector.broadcast %185 : vector<1x64xf32> to vector<16x64xf32>
    %207 = arith.addf %205, %206 : vector<16x64xf32>
    %208 = vector.extract_strided_slice %207 {offsets = [0, 0], sizes = [8, 64], strides = [1, 1]} : vector<16x64xf32> to vector<8x64xf32>
    %cst_67 = arith.constant dense<0.000000e+00> : vector<64xf32>
    %209 = vector.multi_reduction <add>, %208, %cst_67 [0] : vector<8x64xf32> to vector<64xf32>
    %210 = vector.shape_cast %209 : vector<64xf32> to vector<1x64xf32>
    %cst_68 = arith.constant 8.000000e+00 : f32
    %211 = vector.broadcast %cst_68 : f32 to vector<1x64xf32>
    %212 = arith.divf %210, %211 : vector<1x64xf32>
    %213 = vector.extract_strided_slice %207 {offsets = [8, 0], sizes = [8, 64], strides = [1, 1]} : vector<16x64xf32> to vector<8x64xf32>
    %cst_69 = arith.constant dense<0.000000e+00> : vector<64xf32>
    %214 = vector.multi_reduction <add>, %213, %cst_69 [0] : vector<8x64xf32> to vector<64xf32>
    %215 = vector.shape_cast %214 : vector<64xf32> to vector<1x64xf32>
    %cst_70 = arith.constant 8.000000e+00 : f32
    %216 = vector.broadcast %cst_70 : f32 to vector<1x64xf32>
    %217 = arith.divf %215, %216 : vector<1x64xf32>
    %218 = tpu.concatenate %212, %217 in 1 : vector<1x64xf32>, vector<1x64xf32> -> vector<1x128xf32>
    %c0_71 = arith.constant 0 : index
    %c0_72 = arith.constant 0 : index
    %219 = vector.load %arg9[%c0_71, %c0_72] : memref<1x128xf32, #tpu.memory_space<vmem>>, vector<1x128xf32>
    tpu.vector_store %arg9[%c0_71, %c0_72], %218 {strides = array<i32>} : memref<1x128xf32, #tpu.memory_space<vmem>>, vector<1x128xf32>,
    return
  }
}

</mosaic_0001>

<bundles_post_ra>
// kernel: tpu_custom_call.1
= control target key start
LH: loop header
LB: loop body
LE: loop exit
PB: predicated region body
PF: predicated region fallthrough
CT: control target
= control target key end

     0   :  { %14 = vsyncpa [#allocation3], 0  ;;  %s2031_s0 = inlined_call_operand.vmem [shape: f32[16,32], index: 0, kind: input, shape index: {}]   ;;  %s2032_s1 = inlined_call_operand.hbm [shape: f32[8,32], index: 1, kind: input, shape index: {}]   ;;  %s2033_s2 = inlined_call_operand.hbm [shape: bf16[64,192], index: 2, kind: input, shape index: {}]   ;;  %s2034_s3 = inlined_call_operand.vmem [shape: bf16[64,64], index: 3, kind: input, shape index: {}]   ;;  %s2035_s4 = inlined_call_operand.vmem [shape: bf16[64,32], index: 4, kind: input, shape index: {}]   ;;  %s2036_s5 = inlined_call_operand.hbm [shape: bf16[32,64], index: 5, kind: input, shape index: {}]   ;;  %s2037_s6 = inlined_call_operand.vmem [shape: f32[1,192], index: 6, kind: input, shape index: {}]   ;;  %s2038_s7 = inlined_call_operand.vmem [shape: f32[7,64], index: 7, kind: input, shape index: {}]   ;;  %s2039_s8 = inlined_call_operand.hbm [shape: f32[16,16], index: 8, kind: input, shape index: {}]   ;;  %s2040_s9 = inlined_call_operand.hbm [shape: f32[1,128], index: 9, kind: output, shape index: {}]  }
   0x1   :  { %15 = vsyncpa [#allocation6], 0 }
   0x2   :  { %16 = vsyncpa [#allocation9], 0 }
   0x3   :  { %17 = vsyncpa [#allocation4], 0  ;;  %s1710_s30 = smov [#allocation5]  }
   0x4   :  { %s35_s10 = sshll.u32 %s1710_s30, 4  ;;  %s36_s10 = int_to_ptr.vmem [resolvable:$true] %s35_s10 }
   0x5   :  { %s1610_s11 = scalar_lea.vmem %s36_s10, 1024  ;;  %p1615_p1 = scmp.lt.s32.totalorder %s36_s10, %s36_s10 }
   0x6   :  { %p1611_p0 = scmp.ne.s32.totalorder %s36_s10, %s1610_s11  ;;  %p1616_p2 = scmp.lt.s32.totalorder %s1610_s11, %s1610_s11 }
   0x8   :  { %p1617_p3 = por %p1616_p2, %p1615_p1 }
   0xa   :  { %p1618_p4 = pnand %p1617_p3, %p1611_p0 }
   0xc   :  { %1621 = shalt.err (!%p1618_p4)
}
   0xd   :  { %s1711_s12 = smov 128   ;;  %s1712_s13 = smov 8  }
   0xe   :  { %41 = dma.hbm_to_vmem [thread:$0]  %s2033_s2, 1024, %s36_s10, [#allocation6], %s1711_s12, %s1711_s12, %s1712_s13  }
   0xf   :  { %s1713_s16 = smov [#allocation2]   ;;  %s1714_s18 = smov [#allocation7]  }
  0x10   :  { %s26_s17 = sshll.u32 %s1713_s16, 4  ;;  %s51_s19 = sshll.u32 %s1714_s18, 4  ;;  %s27_s17 = int_to_ptr.vmem [resolvable:$true] %s26_s17  ;;  %s52_s19 = int_to_ptr.vmem [resolvable:$true] %s51_s19 }
  0x11   :  { %s1630_s20 = scalar_lea.vmem %s27_s17, 128  ;;  %p1635_p6 = scmp.lt.s32.totalorder %s27_s17, %s27_s17 }
  0x12   :  { %p1631_p5 = scmp.ne.s32.totalorder %s27_s17, %s1630_s20  ;;  %p1636_p7 = scmp.lt.s32.totalorder %s1630_s20, %s1630_s20 }
  0x14   :  { %p1637_p8 = por %p1636_p7, %p1635_p6 }
  0x16   :  { %p1638_p9 = pnand %p1637_p8, %p1631_p5 }
  0x18   :  { %1641 = shalt.err (!%p1638_p9)
}
  0x19   :  { %29 = dma.hbm_to_vmem [thread:$0]  %s2032_s1, 128, %s27_s17, [#allocation3]  }
  0x1a   :  { %s1650_s23 = scalar_lea.vmem %s52_s19, 256  ;;  %p1655_p11 = scmp.lt.s32.totalorder %s52_s19, %s52_s19 }
  0x1b   :  { %p1651_p10 = scmp.ne.s32.totalorder %s52_s19, %s1650_s23  ;;  %p1656_p12 = scmp.lt.s32.totalorder %s1650_s23, %s1650_s23 }
  0x1d   :  { %p1657_p13 = por %p1656_p12, %p1655_p11 }
  0x1f   :  { %p1658_p0 = pnand %p1657_p13, %p1651_p10 }
  0x21   :  { %1661 = shalt.err (!%p1658_p0)
}
  0x22   :  { %s1715_s2 = smov 64   ;;  %s1716_s24 = smov 4  }
  0x23   :  { %57 = dma.hbm_to_vmem [thread:$0]  %s2036_s5, 256, %s52_s19, [#allocation6], %s1715_s2, %s1715_s2, %s1716_s24  }
  0x24   :  { %s1717_s27 = smov [#allocation8]  }
  0x25   :  { %s67_s28 = sshll.u32 %s1717_s27, 4  ;;  %s68_s28 = int_to_ptr.vmem [resolvable:$true] %s67_s28 }
  0x26   :  { %s1670_s1 = scalar_lea.vmem %s68_s28, 256  ;;  %p1675_p2 = scmp.lt.s32.totalorder %s68_s28, %s68_s28 }
  0x27   :  { %p1671_p1 = scmp.ne.s32.totalorder %s68_s28, %s1670_s1  ;;  %p1676_p3 = scmp.lt.s32.totalorder %s1670_s1, %s1670_s1 }
  0x29   :  { %p1677_p4 = por %p1676_p3, %p1675_p2 }
  0x2b   :  { %p1678_p5 = pnand %p1677_p4, %p1671_p1 }
  0x2d   :  { %1681 = shalt.err (!%p1678_p5)
}
  0x2e   :  { %73 = dma.hbm_to_vmem [thread:$0]  %s2039_s8, 256, %s68_s28, [#allocation9], %s1711_s12, %s1711_s12, %s1712_s13  }
  0x2f   :  { %1702 = dma.done.wait [#allocation3], 128  }
  0x30   :  { %1703 = vsyncadd [#allocation3], 4294967168 }
  0x31   :  { %1704 = dma.done.wait [#allocation6], 1280  }
  0x32   :  { %1705 = vsyncadd [#allocation6], 4294966016 }
  0x33   :  { %1706 = dma.done.wait [#allocation9], 256  }
  0x34   :  { %1707 = vsyncadd [#allocation9], 4294967040  ;;  %v1718_v0 = vmov 0.0   ;;  %vm1719_vm0 = vmmov 0   ;;  %vm94_vm1 = vcmask 261120   ;;  %v1809_v1 = vld [vmem:[%s2031_s0 + $0x8] sm:$0xff]  ;;  %v310_v51 = vlaneseq }
  0x35   :  { %1394 = vmatprep.subr.mxu0 %v1718_v0  ;;  %1398 = vmatprep.mubr.msk.f32.mxu0 %vm1719_vm0, %v1718_v0  ;;  %v1814_v2 = vld [vmem:[%s2031_s0] sm:$0xff]  ;;  %vm199_vm2 = vcmask 1043456   ;;  %vm174_vm3 = vcmask 130048   ;;  %vm195_vm4 = vcmask 64512   ;;  %s1720_s0 = smov 120   ;;  %s1721_s12 = smov 32  }
  0x36   :  { %1401 = vmatprep.subr.bf16.mxu1 %v1718_v0  ;;  %1403 = vmatprep.mubr.msk.bf16.mxu1 %vm1719_vm0, %v1718_v0  ;;  %v89_v3 = vld [vmem:[#allocation2] sm:$0xff]  ;;  %v1533_v31 = vld [vmem:[#allocation5 + $0x24] ss:$8 sps:$4 sm:$0xff]   ;;  %v1531_v32 = vld [vmem:[#allocation5 + $0x20] ss:$8 sps:$4 sm:$0xff]   ;;  %v1722_v41 = vmov 0  }
  0x37   :  { %1395 = vmatpush3.xpose.msk.msra.mxu0 %vm94_vm1, %v1809_v1  ;;  %v93_v4 = vpack.c.bf16 %v89_v3, %v89_v3  ;;  %v1528_v29 = vld [vmem:[#allocation5 + $0x30] ss:$8 sps:$4 sm:$0xff]   ;;  %v1530_v30 = vld [vmem:[#allocation5 + $0x34] ss:$8 sps:$4 sm:$0xff]   ;;  %v1539_v36 = vld [vmem:[#allocation5 + $0x4] ss:$8 sps:$4 sm:$0xff]  }
  0x38   :  { %1396 = vmatprep.subr.mxu0 %v1718_v0  ;;  %v1536_v33 = vld [vmem:[#allocation5 + $0x14] ss:$8 sps:$4 sm:$0xff]   ;;  %v1534_v35 = vld [vmem:[#allocation5 + $0x10] ss:$8 sps:$4 sm:$0xff]   ;;  %v1537_v39 = vld [vmem:[#allocation5] ss:$8 sps:$4 sm:$0xff]  }
  0x39   :  { %v201_v5 = vsel %vm199_vm2, %v93_v4, 0  ;;  %vm360_vm5 = vcmask 523264   ;;  %v1846_v52 = vshrl.u32 %v310_v51, 7  ;;  %v308_v54 = vld [vmem:[%s2037_s6] sm:$0x3]  ;;  %s1723_s15 = smov 48  }
  0x3a   :  { %1402 = vmatpush3.bf16.msra.mxu1 %v201_v5  ;;  %s1724_s16 = smov 112   ;;  %s1725_s6 = smov 16   ;;  %vm918_vm6 = vcmask 392192  }
  0x3b   :  { %1397 = vmatpush3.xpose.msk.msra.mxu0 %vm94_vm1, %v1814_v2  ;;  %372 = vmatprep.subr.bf16.mxu1 %v1530_v30  ;;  %v312_v53 = vsub.s32 0, %v1846_v52  ;;  %s1726_s17 = smov 96   ;;  %s1727_s18 = smov 80   ;;  %v316_v62 = vsub.s32 1, %v1846_v52 }
  0x3c   :  { %1407 = vmatprep.subr.bf16.mxu0 %v1718_v0 }
  0x3d   :  { %v313_v56 = vrot.slane %v308_v54, %v312_v53 }
  0x3e   :  { %1399 = vmatmul.mubr.msk.f32.vlgmr.msra.gmra.mxu0 %vm94_vm1, %v89_v3 }
  0x3f   :  { %1409 = vmatprep.mubr.msk.bf16.mxu0 %vm1719_vm0, %v1718_v0  ;;  %1408 = vmatpush3.bf16.msra.mxu0 %v201_v5  ;;  %v317_v5 = vrot.slane %v308_v54, %v316_v62 }
  0x40   :  { %1413 = vmatprep.subr.bf16.mxu0 %v1718_v0 }
  0xfe   :  { %v170_v6 = vpop.f32.mrf.mxu0 }
  0xff   :  { %v175_v7 = vsel %vm174_vm3, %v170_v6, -inf }
 0x100   :  { %v176_v8 = vrot.slane %v175_v7, 4  ;;  %v1400_v9 = vpop.f32.mrf.mxu0 }
 0x102   :  { %v177_v10 = vmax.f32 %v175_v7, %v176_v8 }
 0x104   :  { %v178_v11 = vrot.slane %v177_v10, 2 }
 0x106   :  { %v179_v12 = vmax.f32 %v177_v10, %v178_v11 }
 0x108   :  { %v180_v13 = vrot.slane %v179_v12, 1 }
 0x10a   :  { %v181_v14 = vmax.f32 %v179_v12, %v180_v13 }
 0x10c   :  { %v182_v15 = vsub.f32 %v170_v6, %v181_v14 }
 0x10e   :  { %v183_v16 = vmul.f32 1.442695, %v182_v15 }
 0x110   :  { %1550 = vpow2.f32 %v183_v16  ;;  %v91_v16 = vld [vmem:[#allocation8] sm:$0xff] }
 0x11d   :  { %v1551_v17 = vpop.eup %1550 }
 0x11e   :  { %v185_v18 = vsel %vm174_vm3, %v1551_v17, 0.0 }
 0x11f   :  { %v186_v19 = vrot.slane %v185_v18, 4 }
 0x121   :  { %v187_v20 = vadd.f32 %v186_v19, %v185_v18 }
 0x123   :  { %v188_v21 = vrot.slane %v187_v20, 2 }
 0x125   :  { %v189_v22 = vadd.f32 %v188_v21, %v187_v20 }
 0x127   :  { %v190_v23 = vrot.slane %v189_v22, 1 }
 0x129   :  { %v191_v24 = vadd.f32 %v190_v23, %v189_v22  ;;  %v92_v22 = vld [vmem:[#allocation8 + $0x8] sm:$0xff] }
 0x12b   :  { %1552 = vrcp.f32 %v191_v24 }
 0x138   :  { %v1553_v25 = vpop.eup %1552 }
 0x139   :  { %v193_v26 = vmul.f32 %v1553_v25, %v1551_v17 }
 0x13b   :  { %v194_v27 = vpack.c.bf16 %v193_v26, %v193_v26 }
 0x13d   :  { %244 = vrot.lane.b32.xlu0 %v194_v27, %s1720_s0  ;;  %1404 = vmatmul.mubr.msk.bf16.vlgmr.msra.gmra.mxu1 %vm195_vm4, %v194_v27 }
 0x13e   :  { %373 = vmatpush1.bf16.msra.mxu1 %v1528_v29  ;;  %396 = vmatprep.mubr.bf16.mxu1 %v1722_v41 }
 0x13f   :  { %374 = vmatprep.subr.bf16.mxu1 %v1533_v31 }
 0x142   :  { %375 = vmatpush1.bf16.msra.mxu1 %v1531_v32 }
 0x143   :  { %376 = vmatprep.subr.bf16.mxu1 %v1536_v33 }
 0x146   :  { %377 = vmatpush1.bf16.msra.mxu1 %v1534_v35 }
 0x147   :  { %378 = vmatprep.subr.bf16.mxu1 %v1539_v36 }
 0x14a   :  { %379 = vmatpush1.bf16.msra.mxu1 %v1537_v39 }
 0x14b   :  { %1425 = vmatprep.subr.bf16.mxu1 %v1718_v0 }
 0x1af   :  { %v245_v28 = vpop.permute.xlu0 %244 }
 0x1b0   :  { %1410 = vmatmul.mubr.msk.bf16.vlgmr.msra.gmra.mxu0 %vm195_vm4, %v245_v28 }
 0x1b1   :  { %1415 = vmatprep.mubr.msk.bf16.mxu0 %vm1719_vm0, %v1718_v0 }
 0x1fd   :  { %v237_v34 = vpop.f32.mrf.mxu1 }
 0x1fe   :  { %291 = vrot.lane.b32.xlu0 %v237_v34, %s1721_s12 }
 0x1ff   :  { %v1405_v37 = vpop.f32.mrf.mxu1 }
 0x201   :  { %v240_v38 = vpop.f32.mrf.mxu1 }
 0x203   :  { %v1406_v40 = vpop.f32.mrf.mxu1 }
 0x270   :  { %v283_v42 = vpop.f32.mrf.mxu0  ;;  %v292_v46 = vpop.permute.xlu0 %291 }
 0x271   :  { %293 = vrot.lane.b32.xlu1 %v283_v42, %s1721_s12  ;;  %v1835_v48 = vsel %vm94_vm1, %v1814_v2, %v292_v46 }
 0x272   :  { %v1411_v43 = vpop.f32.mrf.mxu0 }
 0x274   :  { %v286_v44 = vpop.f32.mrf.mxu0 }
 0x276   :  { %v1412_v45 = vpop.f32.mrf.mxu0 }
 0x2e3   :  { %v294_v47 = vpop.permute.xlu1 %293 }
 0x2e4   :  { %v1839_v49 = vsel %vm94_vm1, %v1809_v1, %v294_v47 }
 0x2e5   :  { %v299_v50 = vpack.c.bf16 %v1839_v49, %v1835_v48 }
 0x2e7   :  { %1336 = vmatmul.mubr.msk.bf16.vlgmr.msra.gmra.mxu1 %vm360_vm5, %v299_v50 }
 0x2e8   :  { %1427 = vmatprep.mubr.msk.bf16.mxu1 %vm1719_vm0, %v1718_v0 }
 0x3a7   :  { %v398_v55 = vpop.f32.mrf.mxu1 }
 0x3a8   :  { %v399_v59 = vadd.f32 %v398_v55, %v313_v56 }
 0x3a9   :  { %v400_v57 = vpop.f32.mrf.mxu1 }
 0x3aa   :  { %v401_v7 = vadd.f32 %v400_v57, %v317_v5 }
 0x3ab   :  { %v402_v58 = vpop.f32.mrf.mxu1 }
 0x3ac   :  { %v403_v60 = vadd.f32 %v402_v58, %v313_v56 }
 0x3ad   :  { %v404_v2 = vpop.f32.mrf.mxu1 }
 0x3ae   :  { %v407_v61 = vpack.c.bf16 %v403_v60, %v399_v59  ;;  %v405_v6 = vadd.f32 %v404_v2, %v317_v5 }
 0x3b0   :  { %528 = vrot.lane.b32.xlu0 %v407_v61, %s1723_s15  ;;  %410 = vrot.lane.b32.xlu1 %v407_v61, %s1715_s2  ;;  %v1868_v9 = vpack.c.bf16 %v405_v6, %v401_v7 }
 0x3b4   :  { %650 = vrot.lane.b32.xlu0 %v407_v61, %s1721_s12  ;;  %526 = vrot.lane.b32.xlu1 %v407_v61, %s1724_s16 }
 0x3b8   :  { %771 = vrot.lane.b32.xlu0 %v407_v61, %s1725_s6  ;;  %648 = vrot.lane.b32.xlu1 %v407_v61, %s1726_s17 }
 0x3bc   :  { %769 = vrot.lane.b32.xlu1 %v407_v61, %s1727_s18 }
 0x422   :  { %v529_v63 = vpop.permute.xlu0 %528  ;;  %v411_v1 = vpop.permute.xlu1 %410 }
 0x423   :  { %v534_v3 = vsel %vm174_vm3, %v529_v63, 0  ;;  %v416_v4 = vsel %vm174_vm3, %v411_v1, 0 }
 0x424   :  { %1414 = vmatpush3.bf16.xpose.msra.mxu0 %v416_v4  ;;  %1426 = vmatpush3.bf16.xpose.msra.mxu1 %v534_v3 }
 0x425   :  { %1419 = vmatprep.subr.bf16.mxu0 %v1718_v0  ;;  %1437 = vmatprep.subr.bf16.mxu1 %v1718_v0 }
 0x426   :  { %v651_v8 = vpop.permute.xlu0 %650  ;;  %v527_v10 = vpop.permute.xlu1 %526 }
 0x427   :  { %v656_v11 = vsel %vm174_vm3, %v651_v8, 0 }
 0x42a   :  { %v772_v12 = vpop.permute.xlu0 %771  ;;  %v649_v13 = vpop.permute.xlu1 %648 }
 0x42b   :  { %1416 = vmatmul.mubr.msk.bf16.vlgmr.msra.gmra.mxu0 %vm174_vm3, %v407_v61  ;;  %1428 = vmatmul.mubr.msk.bf16.vlgmr.msra.gmra.mxu1 %vm174_vm3, %v527_v10  ;;  %v777_v14 = vsel %vm174_vm3, %v772_v12, 0 }
 0x42c   :  { %1420 = vmatpush3.bf16.msra.mxu0 %v1868_v9  ;;  %1438 = vmatpush3.bf16.xpose.msra.mxu1 %v656_v11 }
 0x42d   :  { %1439 = vmatprep.mubr.msk.bf16.mxu1 %vm1719_vm0, %v1718_v0  ;;  %1449 = vmatprep.subr.bf16.mxu1 %v1718_v0 }
 0x42e   :  { %1421 = vmatprep.mubr.msk.bf16.mxu0 %vm1719_vm0, %v1718_v0  ;;  %1431 = vmatprep.subr.bf16.mxu0 %v1718_v0  ;;  %v770_v15 = vpop.permute.xlu1 %769 }
 0x433   :  { %1440 = vmatmul.mubr.msk.bf16.vlgmr.msra.gmra.mxu1 %vm174_vm3, %v649_v13 }
 0x434   :  { %1450 = vmatpush3.bf16.xpose.msra.mxu1 %v777_v14  ;;  %1451 = vmatprep.mubr.msk.bf16.mxu1 %vm1719_vm0, %v1718_v0 }
 0x435   :  { %1461 = vmatprep.subr.bf16.mxu1 %v1718_v0 }
 0x43b   :  { %1452 = vmatmul.mubr.msk.bf16.vlgmr.msra.gmra.mxu1 %vm174_vm3, %v770_v15 }
 0x43c   :  { %1469 = vmatprep.mubr.msk.bf16.mxu1 %vm1719_vm0, %v1718_v0 }
 0x4eb   :  { %v452_v17 = vpop.f32.mrf.mxu0  ;;  %v570_v18 = vpop.f32.mrf.mxu1 }
 0x4ec   :  { %v453_v19 = vadd.f32 %v452_v17, %v91_v16  ;;  %v1888_v23 = vadd.f32 %v570_v18, %v91_v16 }
 0x4ed   :  { %v1417_v20 = vpop.f32.mrf.mxu0  ;;  %v1429_v21 = vpop.f32.mrf.mxu1 }
 0x4ee   :  { %v459_v24 = vsel %vm174_vm3, %v453_v19, -inf  ;;  %v577_v31 = vsel %vm174_vm3, %v1888_v23, -inf }
 0x4ef   :  { %v573_v25 = vpop.f32.mrf.mxu1  ;;  %460 = vmax.xlane.f32.xlu0 %v459_v24  ;;  %v455_v26 = vpop.f32.mrf.mxu0 }
 0x4f0   :  { %v456_v27 = vadd.f32 %v455_v26, %v92_v22  ;;  %v574_v30 = vadd.f32 %v573_v25, %v92_v22 }
 0x4f1   :  { %v1418_v28 = vpop.f32.mrf.mxu0  ;;  %v1430_v29 = vpop.f32.mrf.mxu1 }
 0x4f2   :  { %v462_v32 = vsel %vm174_vm3, %v456_v27, -inf  ;;  %v580_v36 = vsel %vm174_vm3, %v574_v30, -inf }
 0x4f3   :  { %v692_v33 = vpop.f32.mrf.mxu1  ;;  %578 = vmax.xlane.f32.xlu0 %v577_v31  ;;  %463 = vmax.xlane.f32.xlu1 %v462_v32 }
 0x4f4   :  { %v1894_v34 = vadd.f32 %v692_v33, %v91_v16 }
 0x4f5   :  { %v1441_v35 = vpop.f32.mrf.mxu1 }
 0x4f6   :  { %v699_v37 = vsel %vm174_vm3, %v1894_v34, -inf }
 0x4f7   :  { %v695_v38 = vpop.f32.mrf.mxu1  ;;  %581 = vmax.xlane.f32.xlu0 %v580_v36  ;;  %700 = vmax.xlane.f32.xlu1 %v699_v37 }
 0x4f8   :  { %v696_v39 = vadd.f32 %v695_v38, %v92_v22 }
 0x4f9   :  { %v1442_v40 = vpop.f32.mrf.mxu1 }
 0x4fa   :  { %v702_v41 = vsel %vm174_vm3, %v696_v39, -inf }
 0x4fb   :  { %v813_v42 = vpop.f32.mrf.mxu1  ;;  %703 = vmax.xlane.f32.xlu0 %v702_v41 }
 0x4fc   :  { %v814_v43 = vadd.f32 %v813_v42, %v91_v16 }
 0x4fd   :  { %v1453_v44 = vpop.f32.mrf.mxu1 }
 0x4fe   :  { %v820_v45 = vsel %vm174_vm3, %v814_v43, -inf }
 0x4ff   :  { %v816_v46 = vpop.f32.mrf.mxu1  ;;  %821 = vmax.xlane.f32.xlu1 %v820_v45 }
 0x500   :  { %v817_v47 = vadd.f32 %v816_v46, %v92_v22 }
 0x501   :  { %v1454_v50 = vpop.f32.mrf.mxu1 }
 0x502   :  { %v823_v51 = vsel %vm174_vm3, %v817_v47, -inf }
 0x503   :  { %824 = vmax.xlane.f32.xlu0 %v823_v51 }
 0x578   :  { %v461_v54 = vpop.xlane.xlu0 %460 }
 0x579   :  { %v465_v55 = vsub.f32 %v453_v19, %v461_v54 }
 0x57b   :  { %v467_v56 = vmul.f32 1.442695, %v465_v55 }
 0x57c   :  { %v579_v57 = vpop.xlane.xlu0 %578  ;;  %v464_v58 = vpop.xlane.xlu1 %463 }
 0x57d   :  { %1554 = vpow2.f32 %v467_v56  ;;  %v466_v59 = vsub.f32 %v456_v27, %v464_v58  ;;  %v583_v19 = vsub.f32 %v1888_v23, %v579_v57 }
 0x57f   :  { %v469_v60 = vmul.f32 1.442695, %v466_v59  ;;  %v585_v21 = vmul.f32 1.442695, %v583_v19 }
 0x580   :  { %v582_v61 = vpop.xlane.xlu0 %581  ;;  %v701_v20 = vpop.xlane.xlu1 %700 }
 0x581   :  { %v584_v63 = vsub.f32 %v574_v30, %v582_v61  ;;  %1556 = vpow2.f32 %v469_v60  ;;  %v705_v22 = vsub.f32 %v1894_v34, %v701_v20 }
 0x583   :  { %v587_v1 = vmul.f32 1.442695, %v584_v63  ;;  %v707_v25 = vmul.f32 1.442695, %v705_v22 }
 0x584   :  { %v704_v2 = vpop.xlane.xlu0 %703 }
 0x585   :  { %1558 = vpow2.f32 %v587_v1  ;;  %v706_v3 = vsub.f32 %v696_v39, %v704_v2 }
 0x587   :  { %v709_v4 = vmul.f32 1.442695, %v706_v3 }
 0x588   :  { %v822_v24 = vpop.xlane.xlu1 %821 }
 0x589   :  { %1560 = vpow2.f32 %v709_v4  ;;  %v826_v26 = vsub.f32 %v814_v43, %v822_v24 }
 0x58a   :  { %v1555_v5 = vpop.eup %1554 }
 0x58b   :  { %v471_v6 = vsel %vm174_vm3, %v1555_v5, 0.0  ;;  %v828_v27 = vmul.f32 1.442695, %v826_v26 }
 0x58c   :  { %v825_v7 = vpop.xlane.xlu0 %824  ;;  %472 = vadd.xlane.f32.xlu1 %v471_v6 }
 0x58d   :  { %v827_v8 = vsub.f32 %v817_v47, %v825_v7 }
 0x58e   :  { %v1557_v10 = vpop.eup %1556 }
 0x58f   :  { %v830_v11 = vmul.f32 1.442695, %v827_v8  ;;  %v474_v12 = vsel %vm174_vm3, %v1557_v10, 0.0 }
 0x590   :  { %475 = vadd.xlane.f32.xlu0 %v474_v12 }
 0x591   :  { %1562 = vpow2.f32 %v830_v11 }
 0x592   :  { %v1559_v13 = vpop.eup %1558  ;;  %1564 = vpow2.f32 %v585_v21  ;;  %v1543_v21 = vld [vmem:[%s2034_s3] sm:$0xff]  }
 0x593   :  { %v592_v14 = vsel %vm174_vm3, %v1559_v13, 0.0  ;;  %1566 = vpow2.f32 %v707_v25 }
 0x594   :  { %593 = vadd.xlane.f32.xlu0 %v592_v14  ;;  %1568 = vpow2.f32 %v828_v27  ;;  %v1541_v14 = vld [vmem:[%s2034_s3 + $0x10] sm:$0xff]  }
 0x596   :  { %v1905_v15 = vpop.eup %1560 }
 0x597   :  { %v714_v16 = vsel %vm174_vm3, %v1905_v15, 0.0 }
 0x598   :  { %715 = vadd.xlane.f32.xlu0 %v714_v16 }
 0x59d   :  { %601 = vrot.lane.b32.xlu1 %v1868_v9, %s1724_s16 }
 0x59e   :  { %v1911_v17 = vpop.eup %1562 }
 0x59f   :  { %v835_v18 = vsel %vm174_vm3, %v1911_v17, 0.0  ;;  %v1565_v28 = vpop.eup %1564 }
 0x5a0   :  { %836 = vadd.xlane.f32.xlu0 %v835_v18  ;;  %v589_v29 = vsel %vm174_vm3, %v1565_v28, 0.0  ;;  %v1567_v30 = vpop.eup %1566 }
 0x5a1   :  { %v711_v23 = vsel %vm174_vm3, %v1567_v30, 0.0  ;;  %v1569_v31 = vpop.eup %1568 }
 0x5a2   :  { %v832_v32 = vsel %vm174_vm3, %v1569_v31, 0.0 }
 0x5b6   :  { %722 = vrot.lane.b32.xlu0 %v1868_v9, %s1726_s17 }
 0x5c1   :  { %590 = vadd.xlane.f32.xlu1 %v589_v29 }
 0x5c5   :  { %712 = vadd.xlane.f32.xlu1 %v711_v23 }
 0x5c9   :  { %833 = vadd.xlane.f32.xlu1 %v832_v32 }
 0x5da   :  { %843 = vrot.lane.b32.xlu1 %v1868_v9, %s1727_s18 }
 0x615   :  { %v473_v33 = vpop.xlane.xlu1 %472 }
 0x616   :  { %1570 = vrcp.f32 %v473_v33 }
 0x619   :  { %v476_v34 = vpop.xlane.xlu0 %475  ;;  %v602_v40 = vpop.permute.xlu1 %601 }
 0x61a   :  { %1572 = vrcp.f32 %v476_v34 }
 0x61d   :  { %v594_v41 = vpop.xlane.xlu0 %593 }
 0x61e   :  { %1574 = vrcp.f32 %v594_v41 }
 0x621   :  { %v716_v42 = vpop.xlane.xlu0 %715 }
 0x623   :  { %v1571_v35 = vpop.eup %1570 }
 0x624   :  { %v479_v37 = vmul.f32 %v1571_v35, %v1555_v5 }
 0x627   :  { %v1573_v36 = vpop.eup %1572 }
 0x628   :  { %v480_v38 = vmul.f32 %v1573_v36, %v1557_v10  ;;  %v1540_v10 = vld [vmem:[%s2034_s3 + $0x18] sm:$0xff]  }
 0x629   :  { %v837_v46 = vpop.xlane.xlu0 %836  ;;  %1462 = vmatpush3.bf16.msra.mxu1 %v1540_v10 }
 0x62a   :  { %v481_v39 = vpack.c.bf16 %v480_v38, %v479_v37  ;;  %1463 = vmatprep.subr.bf16.mxu1 %v1718_v0 }
 0x62b   :  { %v1575_v45 = vpop.eup %1574 }
 0x62c   :  { %1422 = vmatmul.mubr.msk.bf16.vlgmr.msra.gmra.mxu0 %vm174_vm3, %v481_v39  ;;  %v598_v51 = vmul.f32 %v1575_v45, %v1559_v13 }
 0x62d   :  { %1432 = vmatpush3.bf16.msra.mxu0 %v602_v40  ;;  %1433 = vmatprep.mubr.msk.bf16.mxu0 %vm1719_vm0, %v1718_v0  ;;  %v723_v56 = vpop.permute.xlu0 %722 }
 0x62e   :  { %1443 = vmatprep.subr.bf16.mxu0 %v1718_v0  ;;  %1464 = vmatpush3.bf16.msra.mxu1 %v1541_v14 }
 0x62f   :  { %1465 = vmatprep.subr.bf16.mxu1 %v1718_v0 }
 0x64a   :  { %v591_v9 = vpop.xlane.xlu1 %590 }
 0x64b   :  { %1576 = vrcp.f32 %v591_v9 }
 0x64e   :  { %v713_v43 = vpop.xlane.xlu1 %712 }
 0x64f   :  { %1578 = vrcp.f32 %v713_v43 }
 0x650   :  { %1580 = vrcp.f32 %v716_v42 }
 0x652   :  { %v834_v44 = vpop.xlane.xlu1 %833 }
 0x653   :  { %1582 = vrcp.f32 %v834_v44  ;;  %v1970_v44 = vld [vmem:[%s2038_s7] sm:$0x7f] }
 0x654   :  { %1584 = vrcp.f32 %v837_v46  ;;  %v933_v45 = vrot.slane %v1970_v44, %v312_v53 }
 0x656   :  { %v844_v63 = vpop.permute.xlu1 %843 }
 0x658   :  { %v1577_v47 = vpop.eup %1576 }
 0x659   :  { %v597_v50 = vmul.f32 %v1577_v47, %v1565_v28 }
 0x65b   :  { %v599_v54 = vpack.c.bf16 %v598_v51, %v597_v50 }
 0x65c   :  { %v1579_v55 = vpop.eup %1578 }
 0x65d   :  { %1434 = vmatmul.mubr.msk.bf16.vlgmr.msra.gmra.mxu0 %vm174_vm3, %v599_v54  ;;  %v1581_v57 = vpop.eup %1580  ;;  %v719_v58 = vmul.f32 %v1579_v55, %v1567_v30 }
 0x65e   :  { %1444 = vmatpush3.bf16.msra.mxu0 %v723_v56  ;;  %1445 = vmatprep.mubr.msk.bf16.mxu0 %vm1719_vm0, %v1718_v0  ;;  %v720_v59 = vmul.f32 %v1581_v57, %v1905_v15 }
 0x65f   :  { %1455 = vmatprep.subr.bf16.mxu0 %v1718_v0 }
 0x660   :  { %v721_v60 = vpack.c.bf16 %v720_v59, %v719_v58  ;;  %v1583_v61 = vpop.eup %1582 }
 0x661   :  { %v1585_v1 = vpop.eup %1584  ;;  %v840_v2 = vmul.f32 %v1583_v61, %v1569_v31 }
 0x662   :  { %v841_v3 = vmul.f32 %v1585_v1, %v1911_v17  ;;  %v1542_v17 = vld [vmem:[%s2034_s3 + $0x8] sm:$0xff]  }
 0x663   :  { %1466 = vmatpush3.bf16.msra.mxu1 %v1542_v17  ;;  %v1034_v17 = vrot.slane %v1970_v44, %v316_v62  ;;  %v1549_v62 = vld [vmem:[#allocation7] sm:$0xff]  }
 0x664   :  { %v842_v4 = vpack.c.bf16 %v841_v3, %v840_v2  ;;  %1467 = vmatprep.subr.bf16.mxu1 %v1718_v0 }
 0x665   :  { %1446 = vmatmul.mubr.msk.bf16.vlgmr.msra.gmra.mxu0 %vm174_vm3, %v721_v60 }
 0x666   :  { %1456 = vmatpush3.bf16.msra.mxu0 %v844_v63  ;;  %1457 = vmatprep.mubr.msk.bf16.mxu0 %vm1719_vm0, %v1718_v0 }
 0x667   :  { %1473 = vmatprep.subr.bf16.mxu0 %v1718_v0  ;;  %1468 = vmatpush3.bf16.msra.mxu1 %v1543_v21 }
 0x668   :  { %1485 = vmatprep.subr.bf16.mxu1 %v1718_v0 }
 0x66d   :  { %1458 = vmatmul.mubr.msk.bf16.vlgmr.msra.gmra.mxu0 %vm174_vm3, %v842_v4 }
 0x66e   :  { %1481 = vmatprep.mubr.msk.bf16.mxu0 %vm1719_vm0, %v1718_v0 }
 0x6ec   :  { %v519_v5 = vpop.f32.mrf.mxu0 }
 0x6ee   :  { %v1423_v6 = vpop.f32.mrf.mxu0 }
 0x6ef   :  { %v1545_v6 = vld [vmem:[%s2035_s4 + $0x10] sm:$0xff]  }
 0x6f0   :  { %v522_v7 = vpop.f32.mrf.mxu0 }
 0x6f2   :  { %v1424_v8 = vpop.f32.mrf.mxu0 }
 0x6f3   :  { %v1547_v8 = vld [vmem:[%s2035_s4] sm:$0xff]  }
 0x71d   :  { %v641_v11 = vpop.f32.mrf.mxu0 }
 0x71f   :  { %v1435_v12 = vpop.f32.mrf.mxu0 }
 0x721   :  { %v644_v13 = vpop.f32.mrf.mxu0 }
 0x722   :  { %v1513_v15 = vpack.i.bf16 %v644_v13, %v641_v11 }
 0x723   :  { %v1436_v16 = vpop.f32.mrf.mxu0 }
 0x724   :  { %1514 = vrot.lane.b32.xlu1 %v1513_v15, %s1725_s6 }
 0x725   :  { %v762_v18 = vpop.f32.mrf.mxu0 }
 0x727   :  { %v1447_v19 = vpop.f32.mrf.mxu0 }
 0x728   :  { %v1039_v19 = vsub.s32 2, %v1846_v52 }
 0x729   :  { %v765_v20 = vpop.f32.mrf.mxu0 }
 0x72a   :  { %v1518_v22 = vpack.i.bf16 %v765_v20, %v762_v18 }
 0x72b   :  { %v1448_v24 = vpop.f32.mrf.mxu0 }
 0x72c   :  { %1519 = vrot.lane.b32.xlu0 %v1518_v22, %s1721_s12  ;;  %v1040_v24 = vrot.slane %v1970_v44, %v1039_v19 }
 0x72d   :  { %v883_v25 = vpop.f32.mrf.mxu0 }
 0x72f   :  { %v1459_v26 = vpop.f32.mrf.mxu0 }
 0x731   :  { %v886_v27 = vpop.f32.mrf.mxu0 }
 0x732   :  { %v1523_v28 = vpack.i.bf16 %v886_v27, %v883_v25 }
 0x733   :  { %v1460_v29 = vpop.f32.mrf.mxu0 }
 0x734   :  { %1524 = vrot.lane.b32.xlu1 %v1523_v28, %s1723_s15  ;;  %v1548_v29 = vld [vmem:[#allocation7 + $0x8] sm:$0xff]  }
 0x796   :  { %v1515_v30 = vpop.permute.xlu1 %1514 }
 0x797   :  { %v1517_v31 = vunpack.i.h.bf16 %v1515_v30  ;;  %v1516_v32 = vunpack.i.l.bf16 %v1515_v30  ;;  %v1054_v30 = vsub.s32 3, %v1846_v52 }
 0x799   :  { %v915_v36 = vsel %vm174_vm3, %v522_v7, %v1517_v31  ;;  %v914_v37 = vsel %vm174_vm3, %v519_v5, %v1516_v32  ;;  %v1546_v7 = vld [vmem:[%s2035_s4 + $0x8] sm:$0xff]  }
 0x79e   :  { %v1520_v23 = vpop.permute.xlu0 %1519 }
 0x79f   :  { %v1522_v33 = vunpack.i.h.bf16 %v1520_v23  ;;  %v1521_v34 = vunpack.i.l.bf16 %v1520_v23  ;;  %v1055_v23 = vrot.slane %v1970_v44, %v1054_v30  ;;  %v1185_v30 = vsub.s32 4, %v1846_v52 }
 0x7a1   :  { %v917_v40 = vsel %vm94_vm1, %v915_v36, %v1522_v33  ;;  %v916_v41 = vsel %vm94_vm1, %v914_v37, %v1521_v34 }
 0x7a6   :  { %v1525_v35 = vpop.permute.xlu1 %1524 }
 0x7a7   :  { %v1527_v38 = vunpack.i.h.bf16 %v1525_v35  ;;  %v1526_v39 = vunpack.i.l.bf16 %v1525_v35 }
 0x7a9   :  { %v920_v9 = vsel %vm918_vm6, %v917_v40, %v1527_v38  ;;  %v919_v42 = vsel %vm918_vm6, %v916_v41, %v1526_v39 }
 0x7aa   :  { %v921_v43 = vpack.c.bf16 %v920_v9, %v919_v42 }
 0x7ac   :  { %1470 = vmatmul.mubr.msk.bf16.vlgmr.msra.gmra.mxu1 %vm360_vm5, %v921_v43 }
 0x7ad   :  { %1489 = vmatprep.mubr.msk.bf16.mxu1 %vm1719_vm0, %v1718_v0  ;;  %1486 = vmatpush3.bf16.msra.mxu1 %v1548_v29 }
 0x7ae   :  { %1487 = vmatprep.subr.bf16.mxu1 %v1718_v0 }
 0x7b1   :  { %1488 = vmatpush3.bf16.msra.mxu1 %v1549_v62 }
 0x86c   :  { %v995_v46 = vpop.f32.mrf.mxu1 }
 0x86d   :  { %v996_v47 = vadd.f32 %v995_v46, %v933_v45 }
 0x86e   :  { %v1471_v50 = vpop.f32.mrf.mxu1 }
 0x86f   :  { %v1002_v51 = vadd.f32 %v996_v47, %v1835_v48 }
 0x870   :  { %v998_v54 = vpop.f32.mrf.mxu1 }
 0x871   :  { %v999_v55 = vadd.f32 %v998_v54, %v933_v45  ;;  %v1004_v56 = vsel %vm360_vm5, %v1002_v51, 0.0 }
 0x872   :  { %1005 = vadd.xlane.f32.xlu0 %v1004_v56  ;;  %v1472_v57 = vpop.f32.mrf.mxu1 }
 0x873   :  { %v1003_v58 = vadd.f32 %v999_v55, %v1839_v49  ;;  %v1544_v49 = vld [vmem:[%s2035_s4 + $0x18] sm:$0xff]   ;;  %s1729_s4 = smov [#allocation10]  }
 0x874   :  { %1474 = vmatpush3.bf16.msra.mxu0 %v1544_v49  ;;  %s1312_s11 = sshll.u32 %s1729_s4, 4  ;;  %s1313_s11 = int_to_ptr.vmem [resolvable:$true] %s1312_s11 }
 0x875   :  { %v1007_v59 = vsel %vm360_vm5, %v1003_v58, 0.0  ;;  %1475 = vmatprep.subr.bf16.mxu0 %v1718_v0  ;;  %s1682_s0 = scalar_lea.vmem %s1313_s11, 16  ;;  %s1686_s12 = scalar_lea.vmem %s1313_s11, 32 }
 0x876   :  { %1008 = vadd.xlane.f32.xlu1 %v1007_v59  ;;  %p1683_p6 = scmp.ne.s32.totalorder %s1313_s11, %s1682_s0  ;;  %p1687_p7 = scmp.lt.s32.totalorder %s1313_s11, %s1313_s11 }
 0x877   :  { %p1688_p8 = scmp.lt.s32.totalorder %s1686_s12, %s1682_s0 }
 0x878   :  { %1476 = vmatpush3.bf16.msra.mxu0 %v1545_v6 }
 0x879   :  { %1477 = vmatprep.subr.bf16.mxu0 %v1718_v0  ;;  %p1689_p9 = por %p1688_p8, %p1687_p7 }
 0x87b   :  { %p1690_p10 = pnand %p1689_p9, %p1683_p6 }
 0x87c   :  { %1478 = vmatpush3.bf16.msra.mxu0 %v1546_v7 }
 0x87d   :  { %1479 = vmatprep.subr.bf16.mxu0 %v1718_v0 }
 0x880   :  { %1480 = vmatpush3.bf16.msra.mxu0 %v1547_v8 }
 0x8fb   :  { %v1006_v60 = vpop.xlane.xlu0 %1005 }
 0x8fc   :  { %v1011_v61 = vmul.f32 0.015625, %v1006_v60 }
 0x8fe   :  { %v1013_v63 = vsub.f32 %v1002_v51, %v1011_v61 }
 0x8ff   :  { %v1009_v53 = vpop.xlane.xlu1 %1008 }
 0x900   :  { %v1012_v1 = vmul.f32 0.015625, %v1009_v53  ;;  %v1015_v2 = vmul.f32 %v1013_v63, %v1013_v63 }
 0x902   :  { %v1014_v3 = vsub.f32 %v1003_v58, %v1012_v1  ;;  %v1017_v48 = vsel %vm360_vm5, %v1015_v2, 0.0 }
 0x903   :  { %1018 = vadd.xlane.f32.xlu0 %v1017_v48 }
 0x904   :  { %v1016_v4 = vmul.f32 %v1014_v3, %v1014_v3 }
 0x906   :  { %v1020_v5 = vsel %vm360_vm5, %v1016_v4, 0.0 }
 0x907   :  { %1021 = vadd.xlane.f32.xlu0 %v1020_v5 }
 0x98c   :  { %v1019_v10 = vpop.xlane.xlu0 %1018 }
 0x98d   :  { %v1023_v11 = vmul.f32 0.015625, %v1019_v10 }
 0x98f   :  { %v1025_v12 = vadd.f32 1e-05, %v1023_v11 }
 0x990   :  { %v1022_v13 = vpop.xlane.xlu0 %1021 }
 0x991   :  { %1586 = vrsqrt.f32 %v1025_v12  ;;  %v1024_v14 = vmul.f32 0.015625, %v1022_v13 }
 0x993   :  { %v1026_v15 = vadd.f32 1e-05, %v1024_v14  ;;  %v1728_v14 = vmov -1.0  }
 0x995   :  { %1588 = vrsqrt.f32 %v1026_v15 }
 0x99e   :  { %v1587_v16 = vpop.eup %1586 }
 0x99f   :  { %v1029_v18 = vmul.f32 %v1587_v16, %v1013_v63 }
 0x9a1   :  { %v1035_v22 = vmul.f32 %v1034_v17, %v1029_v18 }
 0x9a2   :  { %v1589_v20 = vpop.eup %1588 }
 0x9a3   :  { %v1030_v21 = vmul.f32 %v1589_v20, %v1014_v3  ;;  %v2001_v26 = vadd.f32 %v1040_v24, %v1035_v22 }
 0x9a5   :  { %v1036_v25 = vmul.f32 %v1034_v17, %v1030_v21 }
 0x9a7   :  { %v2003_v27 = vadd.f32 %v1040_v24, %v1036_v25 }
 0x9a9   :  { %v1043_v28 = vpack.c.bf16 %v2003_v27, %v2001_v26 }
 0x9ab   :  { %1482 = vmatmul.mubr.msk.bf16.vlgmr.msra.gmra.mxu0 %vm360_vm5, %v1043_v28 }
 0xa6b   :  { %v1117_v31 = vpop.f32.mrf.mxu0 }
 0xa6c   :  { %v1118_v32 = vadd.f32 %v1117_v31, %v1055_v23 }
 0xa6d   :  { %v1483_v33 = vpop.f32.mrf.mxu0 }
 0xa6e   :  { %v1126_v34 = vmul.f32 0.70710677, %v1118_v32  ;;  %v1124_v22 = vmul.f32 0.5, %v1118_v32 }
 0xa6f   :  { %v1120_v35 = vpop.f32.mrf.mxu0 }
 0xa70   :  { %v1132_v36 = vand.u32 2147483647, %v1126_v34  ;;  %v1121_v37 = vadd.f32 %v1120_v35, %v1055_v23  ;;  %vm1128_vm7 = vcmp.ge.f32.partialorder %v1126_v34, 0.0  ;;  %v1186_v23 = vrot.slane %v1970_v44, %v1185_v30 }
 0xa71   :  { %v1484_v38 = vpop.f32.mrf.mxu0  ;;  %v1130_v15 = vsel %vm1128_vm7, 1.0, %v1728_v14 }
 0xa72   :  { %v1134_v39 = vmul.f32 0.3275911, %v1132_v36  ;;  %v1127_v40 = vmul.f32 0.70710677, %v1121_v37  ;;  %v1160_v43 = vsub.f32 0.0, %v1132_v36  ;;  %v1125_v24 = vmul.f32 0.5, %v1121_v37 }
 0xa74   :  { %v1136_v41 = vadd.f32 1.0, %v1134_v39  ;;  %v1133_v9 = vand.u32 2147483647, %v1127_v40  ;;  %v1162_v45 = vmul.f32 %v1160_v43, %v1132_v36  ;;  %vm1129_vm8 = vcmp.ge.f32.partialorder %v1127_v40, 0.0 }
 0xa75   :  { %v1131_v19 = vsel %vm1129_vm8, 1.0, %v1728_v14 }
 0xa76   :  { %1590 = vrcp.f32 %v1136_v41  ;;  %v1135_v0 = vmul.f32 0.3275911, %v1133_v9  ;;  %v1161_v46 = vsub.f32 0.0, %v1133_v9  ;;  %v1164_v51 = vmul.f32 1.442695, %v1162_v45 }
 0xa78   :  { %v1137_v42 = vadd.f32 1.0, %v1135_v0  ;;  %v1163_v54 = vmul.f32 %v1161_v46, %v1133_v9 }
 0xa7a   :  { %1592 = vrcp.f32 %v1137_v42  ;;  %v1166_v59 = vmul.f32 1.442695, %v1163_v54 }
 0xa7b   :  { %1594 = vpow2.f32 %v1164_v51 }
 0xa7c   :  { %1596 = vpow2.f32 %v1166_v59  ;;  %v1279_v59 = vsub.s32 6, %v1846_v52 }
 0xa83   :  { %v1591_v47 = vpop.eup %1590 }
 0xa84   :  { %v1142_v50 = vmul.f32 1.0614054, %v1591_v47 }
 0xa86   :  { %v1144_v55 = vadd.f32 -1.4531521, %v1142_v50 }
 0xa87   :  { %v1593_v56 = vpop.eup %1592 }
 0xa88   :  { %v1146_v57 = vmul.f32 %v1591_v47, %v1144_v55  ;;  %v1143_v58 = vmul.f32 1.0614054, %v1593_v56  ;;  %v1595_v7 = vpop.eup %1594 }
 0xa89   :  { %v1597_v13 = vpop.eup %1596 }
 0xa8a   :  { %v1148_v60 = vadd.f32 1.4214138, %v1146_v57  ;;  %v1145_v61 = vadd.f32 -1.4531521, %v1143_v58  ;;  %v1273_v58 = vsub.s32 5, %v1846_v52 }
 0xa8c   :  { %v1150_v63 = vmul.f32 %v1591_v47, %v1148_v60  ;;  %v1147_v53 = vmul.f32 %v1593_v56, %v1145_v61  ;;  %v1274_v60 = vrot.slane %v1970_v44, %v1273_v58 }
 0xa8e   :  { %v1152_v1 = vadd.f32 -0.28449672, %v1150_v63  ;;  %v1149_v2 = vadd.f32 1.4214138, %v1147_v53  ;;  %v1280_v53 = vrot.slane %v1970_v44, %v1279_v59 }
 0xa90   :  { %v1154_v3 = vmul.f32 %v1591_v47, %v1152_v1  ;;  %v1151_v48 = vmul.f32 %v1593_v56, %v1149_v2 }
 0xa92   :  { %v1156_v4 = vadd.f32 0.2548296, %v1154_v3  ;;  %v1153_v5 = vadd.f32 -0.28449672, %v1151_v48 }
 0xa94   :  { %v1158_v49 = vmul.f32 %v1591_v47, %v1156_v4  ;;  %v1155_v6 = vmul.f32 %v1593_v56, %v1153_v5 }
 0xa96   :  { %v1168_v8 = vmul.f32 %v1595_v7, %v1158_v49  ;;  %v1157_v10 = vadd.f32 0.2548296, %v1155_v6 }
 0xa98   :  { %v1170_v11 = vsub.f32 1.0, %v1168_v8  ;;  %v1159_v12 = vmul.f32 %v1593_v56, %v1157_v10 }
 0xa9a   :  { %v1172_v16 = vmul.f32 %v1170_v11, %v1130_v15  ;;  %v1169_v17 = vmul.f32 %v1597_v13, %v1159_v12 }
 0xa9c   :  { %v1171_v18 = vsub.f32 1.0, %v1169_v17  ;;  %v1174_v20 = vadd.f32 1.0, %v1172_v16 }
 0xa9e   :  { %v1173_v21 = vmul.f32 %v1171_v18, %v1131_v19  ;;  %v1176_v28 = vmul.f32 %v1174_v20, %v1124_v22 }
 0xaa0   :  { %v1175_v25 = vadd.f32 1.0, %v1173_v21 }
 0xaa2   :  { %v1177_v29 = vmul.f32 %v1175_v25, %v1125_v24 }
 0xaa4   :  { %v1178_v62 = vpack.c.bf16 %v1177_v29, %v1176_v28 }
 0xaa6   :  { %1490 = vmatmul.mubr.msk.bf16.vlgmr.msra.gmra.mxu1 %vm94_vm1, %v1178_v62 }
 0xb66   :  { %v1236_v31 = vpop.f32.mrf.mxu1 }
 0xb67   :  { %v1237_v33 = vadd.f32 %v1236_v31, %v1186_v23 }
 0xb68   :  { %v1491_v34 = vpop.f32.mrf.mxu1 }
 0xb69   :  { %v1243_v35 = vadd.f32 %v1237_v33, %v2001_v26 }
 0xb6a   :  { %v1239_v36 = vpop.f32.mrf.mxu1 }
 0xb6b   :  { %v1240_v38 = vadd.f32 %v1239_v36, %v1186_v23  ;;  %v1245_v32 = vsel %vm360_vm5, %v1243_v35, 0.0 }
 0xb6c   :  { %1246 = vadd.xlane.f32.xlu0 %v1245_v32  ;;  %v1492_v37 = vpop.f32.mrf.mxu1 }
 0xb6d   :  { %v1244_v39 = vadd.f32 %v1240_v38, %v2003_v27 }
 0xb6f   :  { %v1248_v40 = vsel %vm360_vm5, %v1244_v39, 0.0 }
 0xb70   :  { %1249 = vadd.xlane.f32.xlu1 %v1248_v40 }
 0xbf5   :  { %v1247_v41 = vpop.xlane.xlu0 %1246 }
 0xbf6   :  { %v1251_v9 = vmul.f32 0.015625, %v1247_v41 }
 0xbf8   :  { %v1253_v0 = vsub.f32 %v1243_v35, %v1251_v9 }
 0xbf9   :  { %v1250_v42 = vpop.xlane.xlu1 %1249 }
 0xbfa   :  { %v1252_v43 = vmul.f32 0.015625, %v1250_v42  ;;  %v1255_v45 = vmul.f32 %v1253_v0, %v1253_v0 }
 0xbfc   :  { %v1254_v46 = vsub.f32 %v1244_v39, %v1252_v43  ;;  %v1257_v26 = vsel %vm360_vm5, %v1255_v45, 0.0 }
 0xbfd   :  { %1258 = vadd.xlane.f32.xlu0 %v1257_v26 }
 0xbfe   :  { %v1256_v47 = vmul.f32 %v1254_v46, %v1254_v46 }
 0xc00   :  { %v1260_v50 = vsel %vm360_vm5, %v1256_v47, 0.0 }
 0xc01   :  { %1261 = vadd.xlane.f32.xlu1 %v1260_v50 }
 0xc86   :  { %v1259_v51 = vpop.xlane.xlu0 %1258 }
 0xc87   :  { %v1263_v54 = vmul.f32 0.015625, %v1259_v51 }
 0xc89   :  { %v1265_v27 = vadd.f32 1e-05, %v1263_v54 }
 0xc8a   :  { %v1262_v55 = vpop.xlane.xlu1 %1261 }
 0xc8b   :  { %1598 = vrsqrt.f32 %v1265_v27  ;;  %v1264_v56 = vmul.f32 0.015625, %v1262_v55 }
 0xc8d   :  { %v1266_v57 = vadd.f32 1e-05, %v1264_v56 }
 0xc8f   :  { %1600 = vrsqrt.f32 %v1266_v57 }
 0xc98   :  { %v1599_v61 = vpop.eup %1598 }
 0xc99   :  { %v1269_v63 = vmul.f32 %v1599_v61, %v1253_v0 }
 0xc9b   :  { %v1275_v1 = vmul.f32 %v1274_v60, %v1269_v63 }
 0xc9c   :  { %v1601_v2 = vpop.eup %1600 }
 0xc9d   :  { %v1270_v3 = vmul.f32 %v1601_v2, %v1254_v46  ;;  %v1281_v48 = vadd.f32 %v1280_v53, %v1275_v1 }
 0xc9f   :  { %v1276_v4 = vmul.f32 %v1274_v60, %v1270_v3  ;;  %v1283_v13 = vsel %vm360_vm5, %v1281_v48, 0.0 }
 0xca0   :  { %v1284_v44 = vrot.slane %v1283_v13, 4 }
 0xca1   :  { %v1282_v5 = vadd.f32 %v1280_v53, %v1276_v4 }
 0xca2   :  { %v1285_v14 = vadd.f32 %v1284_v44, %v1283_v13 }
 0xca3   :  { %v1292_v49 = vsel %vm360_vm5, %v1282_v5, 0.0 }
 0xca4   :  { %v1293_v6 = vrot.slane %v1292_v49, 4  ;;  %v1286_v15 = vrot.slane %v1285_v14, 2 }
 0xca6   :  { %v1294_v7 = vadd.f32 %v1293_v6, %v1292_v49  ;;  %v1287_v16 = vadd.f32 %v1286_v15, %v1285_v14 }
 0xca8   :  { %v1295_v8 = vrot.slane %v1294_v7, 2  ;;  %v1288_v17 = vrot.slane %v1287_v16, 1 }
 0xcaa   :  { %v1296_v10 = vadd.f32 %v1295_v8, %v1294_v7  ;;  %v1289_v18 = vadd.f32 %v1288_v17, %v1287_v16 }
 0xcac   :  { %v1297_v11 = vrot.slane %v1296_v10, 1  ;;  %v1291_v19 = vmul.f32 0.125, %v1289_v18 }
 0xcae   :  { %v1298_v52 = vadd.f32 %v1297_v11, %v1296_v10 }
 0xcb0   :  { %v1299_v12 = vmul.f32 0.125, %v1298_v52 }
 0xcb2   :  { %1301 = vrot.lane.b32.xlu1 %v1299_v12, %s1715_s2 }
 0xd24   :  { %v1302_v20 = vpop.permute.xlu1 %1301 }
 0xd25   :  { %v1304_v21 = vsel %vm360_vm5, %v1291_v19, %v1302_v20 }
 0xd26   :  { %1305 = vst [vmem:[#allocation10] sm:$0x1] %v1304_v21 }
 0xd27   :  { %1693 = shalt.err (!%p1690_p10)
}
 0xd28   :  { %1315 = dma.vmem_to_hbm [thread:$0]  %s1313_s11, 16, %s2040_s9, [#allocation4]  }
 0xd29   :  { %1708 = dma.done.wait [#allocation4], 16  }
 0xd2a   :  { %1709 = vsyncadd [#allocation4], 4294967280 }
 0xd2b   :  { %1319 = vsyncpa [#allocation3], 1 }
 0xd2c   :  { %1320 = vsyncpa [#allocation6], 1 }
 0xd2d   :  { %1321 = vsyncpa [#allocation9], 1 }
 0xd2e   :  { %1322 = vsyncpa [#allocation4], 1 }

</bundles_post_ra>
